<compile_context>
chip_gen: v5e
topology: v5e:2x2
jax: 0.10.0
libtpu: 0.0.40
codegen_flags: <defaults>
</compile_context>

<pallas_src>
import functools

import jax
import jax.numpy as jnp
from jax import lax
from jax.experimental import pallas as pl
from jax.experimental.pallas import tpu as pltpu


def _round_up(x, m):
    return ((x + m - 1) // m) * m


def cbow_kernel(idx_ref, w_ref, out_ref, h_ref, *, vocab_tile):
    """One (batch-tile i, vocab-tile j) grid step.

    idx_ref : VMEM [TB, C]  int32  context indices for this batch tile
    w_ref   : VMEM [V, E]   bf16   full tied weight, resident across the grid
    out_ref : VMEM [TB, TV] f32    logits tile
    h_ref   : VMEM [TB, E]  f32    scratch: context-embedding sum (persists over j)
    """
    j = pl.program_id(1)
    tb, _ = h_ref.shape
    vocab = w_ref.shape[0]
    ctx = idx_ref.shape[1]

    # Compute h[b] = sum_c W[idx[b, c]] once per batch tile (j == 0) and reuse
    # it for every vocab tile.  Expressed as a one-hot counts matmul:
    #   counts[b, v] = #{c : idx[b, c] == v},   h = counts @ W
    # (VPU compares + one MXU matmul; bf16 products are exact in f32 acc).
    @pl.when(j == 0)
    def _():
        idx = idx_ref[...]                                        # [TB, C]
        vocab_iota = lax.broadcasted_iota(jnp.int32, (tb, vocab), 1)
        counts = jnp.zeros((tb, vocab), jnp.float32)
        for c in range(ctx):                                      # C is small & static
            counts = counts + (vocab_iota == idx[:, c:c + 1]).astype(jnp.float32)
        h_ref[...] = lax.dot_general(
            counts.astype(w_ref.dtype), w_ref[...],
            dimension_numbers=(((1,), (0,)), ((), ())),
            preferred_element_type=jnp.float32,
        )

    # logits tile = h @ W_tile^T, slicing the resident W at a 128-aligned
    # offset (no second streamed copy of W).  Contraction on W's last dim so
    # no transposed copy of W is materialized.  bf16 inputs, f32 accumulation.
    v0 = pl.multiple_of(j * vocab_tile, vocab_tile)
    w_tile = w_ref[pl.ds(v0, vocab_tile), :]                      # [TV, E]
    out_ref[...] = lax.dot_general(
        h_ref[...].astype(w_ref.dtype), w_tile,
        dimension_numbers=(((1,), (1,)), ((), ())),
        preferred_element_type=jnp.float32,
    ).astype(out_ref.dtype)


def cbow_forward(idx, weight, *, batch_tile=128, vocab_tile=128,
                 compute_dtype=jnp.bfloat16):
    """logits[b, v] = sum_c W[idx[b, c]] . W[v]   (tied weights, no bias)."""
    B, C = idx.shape
    V, E = weight.shape
    if V % vocab_tile != 0 or E % 128 != 0:
        raise ValueError("V must be divisible by vocab_tile and E by 128")

    # Fill the MXU M dimension: pad the batch up to a multiple of the tile.
    tb = min(batch_tile, _round_up(B, 8))
    b_pad = _round_up(B, tb)
    if b_pad != B:
        idx = jnp.pad(idx, ((0, b_pad - B), (0, 0)))
    idx = idx.astype(jnp.int32)
    w = weight.astype(compute_dtype)           # bf16 halves HBM/VMEM traffic

    grid = (b_pad // tb, V // vocab_tile)
    itemsize = jnp.dtype(compute_dtype).itemsize
    cost = pl.CostEstimate(
        flops=4 * b_pad * V * E + b_pad * V * C,   # gather matmul + projection + counts
        transcendentals=0,
        bytes_accessed=V * E * itemsize + b_pad * C * 4 + b_pad * V * 4,
    )

    # NOTE: out-of-range indices contribute zero to h (PyTorch nn.Embedding
    # would raise); inputs are assumed in [0, V).
    out = pl.pallas_call(
        functools.partial(cbow_kernel, vocab_tile=vocab_tile),
        out_shape=jax.ShapeDtypeStruct((b_pad, V), jnp.float32),
        grid_spec=pltpu.PrefetchScalarGridSpec(
            num_scalar_prefetch=0,
            grid=grid,
            in_specs=[
                # context indices, tiled per batch tile
                pl.BlockSpec((tb, C), lambda i, j: (i, 0)),
                # full tied weight, resident (fetched from HBM once)
                pl.BlockSpec((V, E), lambda i, j: (0, 0)),
            ],
            out_specs=pl.BlockSpec((tb, vocab_tile), lambda i, j: (i, j)),
            scratch_shapes=[pltpu.VMEM((tb, E), jnp.float32)],
        ),
        compiler_params=pltpu.CompilerParams(
            dimension_semantics=("parallel", "arbitrary"),
            vmem_limit_bytes=32 * 1024 * 1024,
        ),
        cost_estimate=cost,
    )(idx, w)
    return out[:B]


if __name__ == "__main__":
    key = jax.random.PRNGKey(0)
    k_idx, k_w = jax.random.split(key)

    num_words = 256   # vocabulary size V
    embed_dim = 128   # embedding dimension E
    batch = 256       # B (>= 128 so the MXU M dim is filled; 2 batch tiles)
    window = 4        # context size C = 2 * window = 8

    # deterministic parameter init (matches nn.Embedding(num_words, embed_dim))
    weight = (jax.random.normal(k_w, (num_words, embed_dim), jnp.float32)
              * 0.02)
    # deterministic example context indices
    x = jax.random.randint(k_idx, (batch, 2 * window), 0, num_words,
                           dtype=jnp.int32)

    logits = cbow_forward(x, weight)
    jax.block_until_ready(logits)

    # pure-JAX reference (weights cast to bf16 to match the kernel's MXU path)
    w_ref = weight.astype(jnp.bfloat16).astype(jnp.float32)
    ref = jnp.take(w_ref, x, axis=0).sum(axis=1) @ w_ref.T

    assert logits.shape == (batch, num_words)
    assert jnp.allclose(logits, ref, atol=2e-3, rtol=2e-2)

    print("KERNEL_OK")
</pallas_src>

<mosaic_0001>
module attributes {stable_mosaic.version = 11 : i64} {
  func.func @cbow_kernel(%arg0: i32, %arg1: i32, %arg2: memref<128x8xi32, #tpu.memory_space<vmem>>, %arg3: memref<256x128xbf16, #tpu.memory_space<vmem>>, %arg4: memref<128x128xf32, #tpu.memory_space<vmem>>, %arg5: memref<128x128xf32, #tpu.memory_space<vmem>>) attributes {dimension_semantics = [#tpu.dimension_semantics<parallel>, #tpu.dimension_semantics<arbitrary>], iteration_bounds = array<i64: 2, 2>, scalar_prefetch = 0 : i64, scratch_operands = 1 : i64, tpu.core_type = #tpu.core_type<tc>, window_params = [{transform_indices = @transform_0, window_bounds = array<i64: 128, 8>}, {pipeline_mode = #tpu.pipeline_mode<synchronous>, transform_indices = @transform_1, window_bounds = array<i64: 256, 128>}, {transform_indices = @transform_2, window_bounds = array<i64: 128, 128>}]} {
    %c0_i32 = arith.constant 0 : i32
    %0 = arith.cmpi eq, %arg1, %c0_i32 : i32
    %1 = arith.extui %0 : i1 to i32
    %c0_i32_0 = arith.constant 0 : i32
    %2 = arith.cmpi ne, %1, %c0_i32_0 : i32
    scf.if %2 {
      %c0_5 = arith.constant 0 : index
      %c0_6 = arith.constant 0 : index
      %11 = vector.load %arg2[%c0_5, %c0_6] : memref<128x8xi32, #tpu.memory_space<vmem>>, vector<128x8xi32>
      %12 = tpu.iota {dimensions = array<i32: 1>} : vector<128x256xi32>
      %cst_7 = arith.constant 0.000000e+00 : f32
      %13 = vector.broadcast %cst_7 : f32 to vector<128x256xf32>
      %14 = vector.extract_strided_slice %11 {offsets = [0, 0], sizes = [128, 1], strides = [1, 1]} : vector<128x8xi32> to vector<128x1xi32>
      %15 = vector.broadcast %14 : vector<128x1xi32> to vector<128x256xi32>
      %16 = arith.cmpi eq, %12, %15 : vector<128x256xi32>
      %17 = arith.extui %16 : vector<128x256xi1> to vector<128x256xi32>
      %18 = arith.sitofp %17 : vector<128x256xi32> to vector<128x256xf32>
      %19 = arith.addf %13, %18 : vector<128x256xf32>
      %20 = vector.extract_strided_slice %11 {offsets = [0, 1], sizes = [128, 1], strides = [1, 1]} : vector<128x8xi32> to vector<128x1xi32>
      %21 = vector.broadcast %20 : vector<128x1xi32> to vector<128x256xi32>
      %22 = arith.cmpi eq, %12, %21 : vector<128x256xi32>
      %23 = arith.extui %22 : vector<128x256xi1> to vector<128x256xi32>
      %24 = arith.sitofp %23 : vector<128x256xi32> to vector<128x256xf32>
      %25 = arith.addf %19, %24 : vector<128x256xf32>
      %26 = vector.extract_strided_slice %11 {offsets = [0, 2], sizes = [128, 1], strides = [1, 1]} : vector<128x8xi32> to vector<128x1xi32>
      %27 = vector.broadcast %26 : vector<128x1xi32> to vector<128x256xi32>
      %28 = arith.cmpi eq, %12, %27 : vector<128x256xi32>
      %29 = arith.extui %28 : vector<128x256xi1> to vector<128x256xi32>
      %30 = arith.sitofp %29 : vector<128x256xi32> to vector<128x256xf32>
      %31 = arith.addf %25, %30 : vector<128x256xf32>
      %32 = vector.extract_strided_slice %11 {offsets = [0, 3], sizes = [128, 1], strides = [1, 1]} : vector<128x8xi32> to vector<128x1xi32>
      %33 = vector.broadcast %32 : vector<128x1xi32> to vector<128x256xi32>
      %34 = arith.cmpi eq, %12, %33 : vector<128x256xi32>
      %35 = arith.extui %34 : vector<128x256xi1> to vector<128x256xi32>
      %36 = arith.sitofp %35 : vector<128x256xi32> to vector<128x256xf32>
      %37 = arith.addf %31, %36 : vector<128x256xf32>
      %38 = vector.extract_strided_slice %11 {offsets = [0, 4], sizes = [128, 1], strides = [1, 1]} : vector<128x8xi32> to vector<128x1xi32>
      %39 = vector.broadcast %38 : vector<128x1xi32> to vector<128x256xi32>
      %40 = arith.cmpi eq, %12, %39 : vector<128x256xi32>
      %41 = arith.extui %40 : vector<128x256xi1> to vector<128x256xi32>
      %42 = arith.sitofp %41 : vector<128x256xi32> to vector<128x256xf32>
      %43 = arith.addf %37, %42 : vector<128x256xf32>
      %44 = vector.extract_strided_slice %11 {offsets = [0, 5], sizes = [128, 1], strides = [1, 1]} : vector<128x8xi32> to vector<128x1xi32>
      %45 = vector.broadcast %44 : vector<128x1xi32> to vector<128x256xi32>
      %46 = arith.cmpi eq, %12, %45 : vector<128x256xi32>
      %47 = arith.extui %46 : vector<128x256xi1> to vector<128x256xi32>
      %48 = arith.sitofp %47 : vector<128x256xi32> to vector<128x256xf32>
      %49 = arith.addf %43, %48 : vector<128x256xf32>
      %50 = vector.extract_strided_slice %11 {offsets = [0, 6], sizes = [128, 1], strides = [1, 1]} : vector<128x8xi32> to vector<128x1xi32>
      %51 = vector.broadcast %50 : vector<128x1xi32> to vector<128x256xi32>
      %52 = arith.cmpi eq, %12, %51 : vector<128x256xi32>
      %53 = arith.extui %52 : vector<128x256xi1> to vector<128x256xi32>
      %54 = arith.sitofp %53 : vector<128x256xi32> to vector<128x256xf32>
      %55 = arith.addf %49, %54 : vector<128x256xf32>
      %56 = vector.extract_strided_slice %11 {offsets = [0, 7], sizes = [128, 1], strides = [1, 1]} : vector<128x8xi32> to vector<128x1xi32>
      %57 = vector.broadcast %56 : vector<128x1xi32> to vector<128x256xi32>
      %58 = arith.cmpi eq, %12, %57 : vector<128x256xi32>
      %59 = arith.extui %58 : vector<128x256xi1> to vector<128x256xi32>
      %60 = arith.sitofp %59 : vector<128x256xi32> to vector<128x256xf32>
      %61 = arith.addf %55, %60 : vector<128x256xf32>
      %62 = arith.truncf %61 : vector<128x256xf32> to vector<128x256xbf16>
      %c0_8 = arith.constant 0 : index
      %c0_9 = arith.constant 0 : index
      %63 = vector.load %arg3[%c0_8, %c0_9] : memref<256x128xbf16, #tpu.memory_space<vmem>>, vector<256x128xbf16>
      %cst_10 = arith.constant dense<0.000000e+00> : vector<128x128xf32>
      %64 = tpu.matmul %62, %63, %cst_10 {dimension_numbers = #tpu.dot_dimension_numbers<[1], [0], [0], [1], [0, 0, 1, 1], [], []>} : vector<128x256xbf16>, vector<256x128xbf16>, vector<128x128xf32> -> vector<128x128xf32>
      %c0_11 = arith.constant 0 : index
      %c0_12 = arith.constant 0 : index
      %65 = vector.load %arg5[%c0_11, %c0_12] : memref<128x128xf32, #tpu.memory_space<vmem>>, vector<128x128xf32>
      tpu.vector_store %arg5[%c0_11, %c0_12], %64 {strides = array<i32>} : memref<128x128xf32, #tpu.memory_space<vmem>>, vector<128x128xf32>,
    } else {
    }
    %c128_i32 = arith.constant 128 : i32
    %3 = arith.muli %arg1, %c128_i32 : i32
    %4 = tpu.assume_multiple %3, 128 : i32
    %5 = arith.index_cast %4 : i32 to index
    %c0 = arith.constant 0 : index
    %6 = vector.load %arg3[%5, %c0] : memref<256x128xbf16, #tpu.memory_space<vmem>>, vector<128x128xbf16>
    %c0_1 = arith.constant 0 : index
    %c0_2 = arith.constant 0 : index
    %7 = vector.load %arg5[%c0_1, %c0_2] : memref<128x128xf32, #tpu.memory_space<vmem>>, vector<128x128xf32>
    %8 = arith.truncf %7 : vector<128x128xf32> to vector<128x128xbf16>
    %cst = arith.constant dense<0.000000e+00> : vector<128x128xf32>
    %9 = tpu.matmul %8, %6, %cst {dimension_numbers = #tpu.dot_dimension_numbers<[1], [1], [0], [0], [0, 0, 1, 0], [], []>} : vector<128x128xbf16>, vector<128x128xbf16>, vector<128x128xf32> -> vector<128x128xf32>
    %c0_3 = arith.constant 0 : index
    %c0_4 = arith.constant 0 : index
    %10 = vector.load %arg4[%c0_3, %c0_4] : memref<128x128xf32, #tpu.memory_space<vmem>>, vector<128x128xf32>
    tpu.vector_store %arg4[%c0_3, %c0_4], %9 {strides = array<i32>} : memref<128x128xf32, #tpu.memory_space<vmem>>, vector<128x128xf32>,
    return
  }
  func.func @transform_0(%arg0: i32, %arg1: i32) -> (i32, i32) {
    %c0_i32 = arith.constant 0 : i32
    %c0_i32_0 = arith.constant 0 : i32
    return %arg0, %c0_i32 : i32, i32
  }
  func.func @transform_1(%arg0: i32, %arg1: i32) -> (i32, i32) {
    %c0_i32 = arith.constant 0 : i32
    %c0_i32_0 = arith.constant 0 : i32
    %c0_i32_1 = arith.constant 0 : i32
    return %c0_i32, %c0_i32_0 : i32, i32
  }
  func.func @transform_2(%arg0: i32, %arg1: i32) -> (i32, i32) {
    %c0_i32 = arith.constant 0 : i32
    return %arg0, %arg1 : i32, i32
  }
}

</mosaic_0001>

<bundles_post_ra>
// kernel: tpu_custom_call.1
= control target key start
LH: loop header
LB: loop body
LE: loop exit
PB: predicated region body
PF: predicated region fallthrough
CT: control target
= control target key end

     0   :  { %7 = vsyncpa [#allocation4], 0  ;;  %s4202_s0 = inlined_call_operand.vmem [shape: s32[256,8], index: 0, kind: input, shape index: {}]   ;;  %s4203_s1 = inlined_call_operand.vmem [shape: bf16[256,128], index: 1, kind: input, shape index: {}]   ;;  %s4204_s2 = inlined_call_operand.hbm [shape: f32[256,256], index: 2, kind: output, shape index: {}]  }
   0x1   :  { %9 = vsyncpa [#allocation4 + $0x1], 0  ;;  %s2807_s9 = smov 0   ;;  %s2809_s10 = smov 0  }
   0x2   :  { %s2811_s11 = smov 0   ;;  %s2813_s12 = smov 0  }
   0x3   :  { %s2815_s13 = smov 0   ;;  %s2817_s14 = smov 0  }
   0x4   :  { %s2819_s15 = smov 0   ;;  %s2821_s16 = smov 0  }
   0x5 LB: > { %s2101_s17 = sadd.s32 4294967295, %s2778_s16   ;;  %s2102_s18 = sadd.s32 4294967294, %s2778_s16   ;;  %s2778_s16 = sphi %s2821_s16, %s15_s16   ;;  %s2774_s15 = sphi %s2819_s15, %s4213_s15   ;;  %s2770_s14 = sphi %s2817_s14, %s4212_s14   ;;  %s2766_s13 = sphi %s2815_s13, %s4211_s13   ;;  %s2762_s12 = sphi %s2813_s12, %s4210_s12   ;;  %s2758_s11 = sphi %s2811_s11, %s4209_s11   ;;  %s2754_s10 = sphi %s2809_s10, %s4208_s10   ;;  %s2750_s9 = sphi %s2807_s9, %s4207_s9  }
   0x6   : > { %s24_s19 = sadd.s32 1, %s2770_s14  ;;  %s27_s20 = sadd.s32 1, %s2774_s15 }
   0x7   : > { %p25_p0 = scmp.ge.s32.totalorder %s24_s19, 2  ;;  %p93_p1 = scmp.ne.s32.totalorder %s2758_s11, %s2754_s10 }
   0x8   : > { %p94_p2 = scmp.eq.s32.totalorder %s2101_s17, 3  ;;  %p99_p5 = scmp.ne.s32.totalorder %s2754_s10, %s2750_s9 }
   0x9   : > { %s4215_s19 = smov (%p25_p0, %s24_s19), 0  ;;  %s4217_s20 = smov (!%p25_p0, %s27_s20), %s2774_s15 }
   0xa   : > { %s79_s21 = ssub.s32 %s2770_s14, %s4215_s19  ;;  %p2858_p3 = por %p94_p2, %p93_p1 }
   0xb   : > { %p29_p4 = scmp.ge.s32.totalorder %s4217_s20, 2  ;;  %p100_p6 = scmp.eq.s32.totalorder %s2102_s18, 3 }
   0xc   : > { %p2105_p7 = scmp.ge.s32.totalorder %s2778_s16, 1  ;;  %p130_p9 = scmp.lt.s32.totalorder %s2778_s16, 5 }
   0xd   : > { %s4219_s20 = smov (%p29_p4, %s4217_s20), 0  ;;  %p2867_p8 = por %p100_p6, %p99_p5 }
   0xe   : > { %s78_s24 = ssub.s32 %s2774_s15, %s4219_s20  ;;  %s83_s25 = sadd.s32 1, %s2758_s11 }
   0xf   : > { %s80_s26 = sor.u32 %s79_s21, %s78_s24  ;;  %p131_p10 = pnand %p2105_p7, %p130_p9 }
  0x10   : > { %p81_p11 = scmp.eq.s32.totalorder %s80_s26, 0  ;;  %s149_s28 = sand.u32 (!%p131_p10), 1, %s2754_s10  }
  0x11   : > { %134 = sbr.rel (%p131_p10) target bundleno = 908 (0x38c), region = 28  ;;  %s2107_s29 = sshll.u32 (!%p131_p10), %s2766_s13, 4 }
  0x12   : > { %s2876_s27 = scalar_select %p81_p11, %s2758_s11, %s83_s25  }
  0x13   : > { %s2106_s30 = sshll.u32 (!%p131_p10), %s149_s28, 7  ;;  %p153_p12 = scmp.lt.s32.totalorder (!%p131_p10), %s2107_s29, 31 }
  0x14   : > { %s2887_s7 = scalar_lea.vmem (!%p131_p10), [#allocation3], %s2106_s30  ;;  %p2109_p13 = scmp.ne.s32.totalorder (!%p131_p10), %s2762_s12, 0 }
  0x16   : > { %s4221_s29 = smov (!%p153_p12, %s2107_s29), 31  ;;  %162 = sbr.rel (%p2109_p13) target bundleno = 677 (0x2a5), region = 32 }
  0x17   : > { %s2108_s3 = sshll.u32 %s4221_s29, 3 }
  0x18   : > { %s2885_s6 = scalar_lea.vmem %s4202_s0, %s2108_s3 }
  0x1b   : > { %v2891_v0 = vld [vmem:[%s2885_s6 + $0x20] sm:$0xff]  ;;  %v2894_v1 = vld [vmem:[%s2885_s6 + $0x10] sm:$0xff]  ;;  %v2780_v3 = vmov 0   ;;  %v2903_v4 = vld [vmem:[%s2885_s6 + $0x28] sm:$0xff]  ;;  %v2781_v17 = vmov 1   ;;  %v2782_v18 = vmov 2   ;;  %v179_v25 = vlaneseq }
  0x1c   : > { %v2897_v2 = vld [vmem:[%s2885_s6] sm:$0xff]  ;;  %2620 = vset.pattern.permute.xlu2 %v2780_v3  ;;  %2619 = vset.pattern.permute.xlu1 %v2780_v3  ;;  %v2906_v5 = vld [vmem:[%s2885_s6 + $0x18] sm:$0xff]  ;;  %v2909_v6 = vld [vmem:[%s2885_s6 + $0x8] sm:$0xff]  ;;  %v2783_v30 = vmov 3   ;;  %v2784_v34 = vmov 0.0  }
  0x1d   : > { %2618 = vset.pattern.permute.xlu0 %v2780_v3  ;;  %195 = vperm.xlu2 %2620, %v2891_v0   ;;  %v2915_v7 = vld [vmem:[%s2885_s6 + $0x40] sm:$0xff]  ;;  %v2918_v8 = vld [vmem:[%s2885_s6 + $0x38] sm:$0xff]  ;;  %v2921_v9 = vld [vmem:[%s2885_s6 + $0x30] sm:$0xff]  ;;  %v2995_v27 = vand.u32 127, %v179_v25 }
  0x1e   : > { %189 = vperm.xlu1 %2619, %v2894_v1   ;;  %183 = vperm.xlu0 %2618, %v2897_v2   ;;  %v2927_v10 = vld [vmem:[%s2885_s6 + $0x58] sm:$0xff]  ;;  %v2930_v11 = vld [vmem:[%s2885_s6 + $0x50] sm:$0xff]  ;;  %v2933_v12 = vld [vmem:[%s2885_s6 + $0x48] sm:$0xff] }
  0x1f   : > { %v2939_v13 = vld [vmem:[%s2885_s6 + $0x70] sm:$0xff]  ;;  %v2942_v14 = vld [vmem:[%s2885_s6 + $0x68] sm:$0xff]  ;;  %v2945_v15 = vld [vmem:[%s2885_s6 + $0x60] sm:$0xff]  ;;  %v3003_v31 = vadd.s32 128, %v2995_v27 }
  0x20   : > { %v2951_v16 = vld [vmem:[%s2885_s6 + $0x78] sm:$0xff] }
  0x25   : > { %198 = vperm.xlu2 %2620, %v2903_v4  }
  0x26   : > { %192 = vperm.xlu1 %2619, %v2906_v5   ;;  %186 = vperm.xlu0 %2618, %v2909_v6  }
  0x2d   : > { %207 = vperm.xlu2 %2620, %v2915_v7  }
  0x2e   : > { %204 = vperm.xlu1 %2619, %v2918_v8   ;;  %201 = vperm.xlu0 %2618, %v2921_v9  }
  0x35   : > { %216 = vperm.xlu2 %2620, %v2927_v10  }
  0x36   : > { %213 = vperm.xlu1 %2619, %v2930_v11   ;;  %210 = vperm.xlu0 %2618, %v2933_v12  }
  0x3d   : > { %225 = vperm.xlu2 %2620, %v2939_v13  }
  0x3e   : > { %222 = vperm.xlu1 %2619, %v2942_v14   ;;  %219 = vperm.xlu0 %2618, %v2945_v15  }
  0x45   : > { %2622 = vset.pattern.permute.xlu2 %v2781_v17 }
  0x46   : > { %2621 = vset.pattern.permute.xlu1 %v2781_v17  ;;  %228 = vperm.xlu0 %2618, %v2951_v16  }
  0x47   : > { %362 = vperm.xlu2 %2622, %v2909_v6   ;;  %359 = vperm.xlu1 %2621, %v2897_v2  }
  0x4e   : > { %2623 = vset.pattern.permute.xlu0 %v2781_v17 }
  0x4f   : > { %371 = vperm.xlu2 %2622, %v2891_v0   ;;  %368 = vperm.xlu1 %2621, %v2906_v5  }
  0x50   : > { %365 = vperm.xlu0 %2623, %v2894_v1  }
  0x57   : > { %377 = vperm.xlu2 %2622, %v2921_v9   ;;  %374 = vperm.xlu1 %2621, %v2903_v4  }
  0x58   : > { %380 = vperm.xlu0 %2623, %v2918_v8  }
  0x5f   : > { %386 = vperm.xlu2 %2622, %v2933_v12   ;;  %383 = vperm.xlu1 %2621, %v2915_v7  }
  0x60   : > { %389 = vperm.xlu0 %2623, %v2930_v11  }
  0x67   : > { %395 = vperm.xlu2 %2622, %v2945_v15   ;;  %392 = vperm.xlu1 %2621, %v2927_v10  }
  0x68   : > { %398 = vperm.xlu0 %2623, %v2942_v14  }
  0x6f   : > { %404 = vperm.xlu2 %2622, %v2951_v16   ;;  %401 = vperm.xlu1 %2621, %v2939_v13  }
  0x70   : > { %2624 = vset.pattern.permute.xlu0 %v2782_v18 }
  0x71   : > { %535 = vperm.xlu0 %2624, %v2897_v2  }
  0x77   : > { %2626 = vset.pattern.permute.xlu2 %v2782_v18  ;;  %2625 = vset.pattern.permute.xlu1 %v2782_v18  ;;  %v196_v19 = vpop.permute.xlu2 %195 }
  0x78   : > { %541 = vperm.xlu2 %2626, %v2894_v1   ;;  %538 = vperm.xlu1 %2625, %v2909_v6   ;;  %vm238_vm4 = vcmp.eq.s32.totalorder %v2995_v27, %v196_v19  ;;  %vm239_vm5 = vcmp.eq.s32.totalorder %v3003_v31, %v196_v19 }
  0x79   : > { %550 = vperm.xlu0 %2624, %v2903_v4   ;;  %v2118_v45 = vsel %vm238_vm4, 1.0, %v2784_v34  ;;  %v2119_v46 = vsel %vm239_vm5, 1.0, %v2784_v34 }
  0x7f   : > { %v2974_v20 = vpop.permute.xlu2 %198 }
  0x80   : > { %547 = vperm.xlu2 %2626, %v2891_v0   ;;  %544 = vperm.xlu1 %2625, %v2906_v5  }
  0x81   : > { %559 = vperm.xlu0 %2624, %v2915_v7  }
  0x87   : > { %v2979_v21 = vpop.permute.xlu2 %207 }
  0x88   : > { %556 = vperm.xlu2 %2626, %v2918_v8   ;;  %553 = vperm.xlu1 %2625, %v2921_v9  }
  0x89   : > { %568 = vperm.xlu0 %2624, %v2927_v10  }
  0x8f   : > { %v2984_v22 = vpop.permute.xlu2 %216 }
  0x90   : > { %v2986_v23 = vpop.permute.xlu1 %189  ;;  %565 = vperm.xlu2 %2626, %v2930_v11   ;;  %562 = vperm.xlu1 %2625, %v2933_v12   ;;  %v2990_v24 = vpop.permute.xlu0 %183 }
  0x91   : > { %577 = vperm.xlu0 %2624, %v2939_v13   ;;  %vm230_vm12 = vcmp.eq.s32.totalorder %v2995_v27, %v2990_v24  ;;  %vm231_vm13 = vcmp.eq.s32.totalorder %v3003_v31, %v2990_v24 }
  0x92   : > { %v2110_v61 = vsel %vm230_vm12, 1.0, %v2784_v34  ;;  %v2111_v62 = vsel %vm231_vm13, 1.0, %v2784_v34 }
  0x97   : > { %v2993_v26 = vpop.permute.xlu2 %225 }
  0x98   : > { %v2997_v28 = vpop.permute.xlu1 %192  ;;  %574 = vperm.xlu2 %2626, %v2942_v14   ;;  %571 = vperm.xlu1 %2625, %v2945_v15   ;;  %v187_v29 = vpop.permute.xlu0 %186 }
  0x99   : > { %2628 = vset.pattern.permute.xlu0 %v2783_v30  ;;  %vm232_vm0 = vcmp.eq.s32.totalorder %v2995_v27, %v187_v29  ;;  %vm233_vm1 = vcmp.eq.s32.totalorder %v3003_v31, %v187_v29  ;;  %vm236_vm4 = vcmp.eq.s32.totalorder %v2995_v27, %v2997_v28  ;;  %vm237_vm5 = vcmp.eq.s32.totalorder %v3003_v31, %v2997_v28 }
  0x9a   : > { %714 = vperm.xlu0 %2628, %v2909_v6   ;;  %v2112_v35 = vsel %vm232_vm0, 1.0, %v2784_v34  ;;  %v2113_v36 = vsel %vm233_vm1, 1.0, %v2784_v34  ;;  %v2117_v28 = vsel %vm237_vm5, 1.0, %v2784_v34 }
  0xa0   : > { %v3007_v32 = vpop.permute.xlu1 %204  ;;  %2627 = vset.pattern.permute.xlu2 %v2783_v30  ;;  %580 = vperm.xlu1 %2625, %v2951_v16   ;;  %v202_v33 = vpop.permute.xlu0 %201 }
  0xa1   : > { %v363_v37 = vpop.permute.xlu2 %362  ;;  %711 = vperm.xlu2 %2627, %v2897_v2   ;;  %vm242_vm8 = vcmp.eq.s32.totalorder %v2995_v27, %v202_v33  ;;  %vm243_vm9 = vcmp.eq.s32.totalorder %v3003_v31, %v202_v33  ;;  %vm245_vm5 = vcmp.eq.s32.totalorder %v3003_v31, %v3007_v32 }
  0xa2   : > { %vm408_vm2 = vcmp.eq.s32.totalorder %v2995_v27, %v363_v37  ;;  %vm409_vm3 = vcmp.eq.s32.totalorder %v3003_v31, %v363_v37  ;;  %729 = vperm.xlu0 %2628, %v2921_v9   ;;  %v2122_v53 = vsel %vm242_vm8, 1.0, %v2784_v34  ;;  %v2123_v54 = vsel %vm243_vm9, 1.0, %v2784_v34 }
  0xa3   : > { %v2144_v38 = vsel %vm408_vm2, 1.0, %v2784_v34  ;;  %v2145_v39 = vsel %vm409_vm3, 1.0, %v2784_v34  ;;  %vm240_vm8 = vcmp.eq.s32.totalorder %v2995_v27, %v2974_v20  ;;  %vm241_vm9 = vcmp.eq.s32.totalorder %v3003_v31, %v2974_v20 }
  0xa4   : > { %v3018_v40 = vadd.f32 %v2144_v38, %v2112_v35  ;;  %v3020_v41 = vadd.f32 %v2145_v39, %v2113_v36  ;;  %v2116_v37 = vsel %vm236_vm4, 1.0, %v2784_v34  ;;  %vm244_vm4 = vcmp.eq.s32.totalorder %v2995_v27, %v3007_v32 }
  0xa8   : > { %v3024_v42 = vpop.permute.xlu1 %213  ;;  %2629 = vset.pattern.permute.xlu1 %v2783_v30  ;;  %v211_v43 = vpop.permute.xlu0 %210 }
  0xa9   : > { %v372_v44 = vpop.permute.xlu2 %371  ;;  %720 = vperm.xlu2 %2627, %v2906_v5   ;;  %717 = vperm.xlu1 %2629, %v2894_v1   ;;  %vm248_vm14 = vcmp.eq.s32.totalorder %v2995_v27, %v211_v43  ;;  %vm249_vm15 = vcmp.eq.s32.totalorder %v3003_v31, %v211_v43 }
  0xaa   : > { %vm414_vm6 = vcmp.eq.s32.totalorder %v2995_v27, %v372_v44  ;;  %vm415_vm7 = vcmp.eq.s32.totalorder %v3003_v31, %v372_v44  ;;  %738 = vperm.xlu0 %2628, %v2933_v12   ;;  %v2128_v63 = vsel %vm248_vm14, 1.0, %v2784_v34  ;;  %v2129_v3 = vsel %vm249_vm15, 1.0, %v2784_v34 }
  0xab   : > { %v2150_v47 = vsel %vm414_vm6, 1.0, %v2784_v34  ;;  %v2151_v48 = vsel %vm415_vm7, 1.0, %v2784_v34 }
  0xac   : > { %v3035_v49 = vadd.f32 %v2150_v47, %v2118_v45  ;;  %v3037_v50 = vadd.f32 %v2151_v48, %v2119_v46  ;;  %v2785_v45 = vmov 4  }
  0xb0   : > { %v3041_v51 = vpop.permute.xlu1 %222  ;;  %v220_v52 = vpop.permute.xlu0 %219 }
  0xb1   : > { %v378_v55 = vpop.permute.xlu2 %377  ;;  %726 = vperm.xlu2 %2627, %v2903_v4   ;;  %723 = vperm.xlu1 %2629, %v2891_v0   ;;  %vm254_vm6 = vcmp.eq.s32.totalorder %v2995_v27, %v220_v52  ;;  %vm255_vm7 = vcmp.eq.s32.totalorder %v3003_v31, %v220_v52 }
  0xb2   : > { %vm418_vm10 = vcmp.eq.s32.totalorder %v2995_v27, %v378_v55  ;;  %vm419_vm11 = vcmp.eq.s32.totalorder %v3003_v31, %v378_v55  ;;  %747 = vperm.xlu0 %2628, %v2945_v15   ;;  %v2134_v38 = vsel %vm254_vm6, 1.0, %v2784_v34  ;;  %v2135_v39 = vsel %vm255_vm7, 1.0, %v2784_v34 }
  0xb3   : > { %v2154_v56 = vsel %vm418_vm10, 1.0, %v2784_v34  ;;  %v2155_v57 = vsel %vm419_vm11, 1.0, %v2784_v34  ;;  %vm234_vm10 = vcmp.eq.s32.totalorder %v2995_v27, %v2986_v23  ;;  %vm235_vm11 = vcmp.eq.s32.totalorder %v3003_v31, %v2986_v23 }
  0xb4   : > { %v3052_v58 = vadd.f32 %v2154_v56, %v2122_v53  ;;  %v3054_v59 = vadd.f32 %v2155_v57, %v2123_v54  ;;  %v2120_v23 = vsel %vm240_vm8, 1.0, %v2784_v34 }
  0xb8   : > { %v3062_v60 = vpop.permute.xlu0 %228 }
  0xb9   : > { %v387_v17 = vpop.permute.xlu2 %386  ;;  %735 = vperm.xlu2 %2627, %v2915_v7   ;;  %732 = vperm.xlu1 %2629, %v2918_v8   ;;  %v360_v18 = vpop.permute.xlu1 %359 }
  0xba   : > { %vm424_vm0 = vcmp.eq.s32.totalorder %v2995_v27, %v387_v17  ;;  %vm425_vm1 = vcmp.eq.s32.totalorder %v3003_v31, %v387_v17  ;;  %vm406_vm2 = vcmp.eq.s32.totalorder %v2995_v27, %v360_v18  ;;  %vm407_vm3 = vcmp.eq.s32.totalorder %v3003_v31, %v360_v18  ;;  %756 = vperm.xlu0 %2628, %v2951_v16  }
  0xbb   : > { %v2160_v19 = vsel %vm424_vm0, 1.0, %v2784_v34  ;;  %v2161_v24 = vsel %vm425_vm1, 1.0, %v2784_v34  ;;  %v2142_v25 = vsel %vm406_vm2, 1.0, %v2784_v34  ;;  %v2143_v29 = vsel %vm407_vm3, 1.0, %v2784_v34 }
  0xbc   : > { %v3079_v30 = vadd.f32 %v2160_v19, %v2128_v63  ;;  %v3081_v33 = vadd.f32 %v2161_v24, %v2129_v3  ;;  %v3083_v35 = vadd.f32 %v2142_v25, %v2110_v61  ;;  %v3085_v36 = vadd.f32 %v2143_v29, %v2111_v62 }
  0xbd   : > { %v2114_v61 = vsel %vm234_vm10, 1.0, %v2784_v34  ;;  %v2115_v62 = vsel %vm235_vm11, 1.0, %v2784_v34  ;;  %vm260_vm2 = vcmp.eq.s32.totalorder %v2995_v27, %v3062_v60  ;;  %vm261_vm3 = vcmp.eq.s32.totalorder %v3003_v31, %v3062_v60 }
  0xbe   : > { %v2121_v19 = vsel %vm241_vm9, 1.0, %v2784_v34  ;;  %v2140_v60 = vsel %vm260_vm2, 1.0, %v2784_v34  ;;  %v2141_v24 = vsel %vm261_vm3, 1.0, %v2784_v34  ;;  %vm246_vm10 = vcmp.eq.s32.totalorder %v2995_v27, %v2979_v21 }
  0xbf   : > { %vm247_vm11 = vcmp.eq.s32.totalorder %v3003_v31, %v2979_v21 }
  0xc1   : > { %v396_v43 = vpop.permute.xlu2 %395  ;;  %744 = vperm.xlu2 %2627, %v2927_v10   ;;  %741 = vperm.xlu1 %2629, %v2930_v11   ;;  %v369_v44 = vpop.permute.xlu1 %368 }
  0xc2   : > { %vm430_vm12 = vcmp.eq.s32.totalorder %v2995_v27, %v396_v43  ;;  %vm431_vm13 = vcmp.eq.s32.totalorder %v3003_v31, %v396_v43  ;;  %vm412_vm14 = vcmp.eq.s32.totalorder %v2995_v27, %v369_v44  ;;  %vm413_vm15 = vcmp.eq.s32.totalorder %v3003_v31, %v369_v44  ;;  %2632 = vset.pattern.permute.xlu0 %v2785_v45  ;;  %v366_v46 = vpop.permute.xlu0 %365 }
  0xc3   : > { %v2166_v47 = vsel %vm430_vm12, 1.0, %v2784_v34  ;;  %v2167_v48 = vsel %vm431_vm13, 1.0, %v2784_v34  ;;  %v2148_v52 = vsel %vm412_vm14, 1.0, %v2784_v34  ;;  %v2149_v53 = vsel %vm413_vm15, 1.0, %v2784_v34  ;;  %893 = vperm.xlu0 %2632, %v2894_v1  }
  0xc4   : > { %v3116_v54 = vadd.f32 %v2166_v47, %v2134_v38  ;;  %v3118_v55 = vadd.f32 %v2167_v48, %v2135_v39  ;;  %v3120_v56 = vadd.f32 %v2148_v52, %v2116_v37  ;;  %v3122_v57 = vadd.f32 %v2149_v53, %v2117_v28 }
  0xc5   : > { %vm410_vm0 = vcmp.eq.s32.totalorder %v2995_v27, %v366_v46  ;;  %vm411_vm1 = vcmp.eq.s32.totalorder %v3003_v31, %v366_v46  ;;  %v2124_v48 = vsel %vm244_vm4, 1.0, %v2784_v34  ;;  %v2125_v52 = vsel %vm245_vm5, 1.0, %v2784_v34 }
  0xc6   : > { %v2146_v63 = vsel %vm410_vm0, 1.0, %v2784_v34  ;;  %v2147_v3 = vsel %vm411_vm1, 1.0, %v2784_v34  ;;  %vm250_vm14 = vcmp.eq.s32.totalorder %v2995_v27, %v3024_v42  ;;  %vm251_vm15 = vcmp.eq.s32.totalorder %v3003_v31, %v3024_v42 }
  0xc7   : > { %v3140_v17 = vadd.f32 %v2146_v63, %v2114_v61  ;;  %v3142_v18 = vadd.f32 %v2147_v3, %v2115_v62  ;;  %v2126_v63 = vsel %vm246_vm10, 1.0, %v2784_v34  ;;  %v2127_v3 = vsel %vm247_vm11, 1.0, %v2784_v34 }
  0xc9   : > { %v405_v25 = vpop.permute.xlu2 %404  ;;  %753 = vperm.xlu2 %2627, %v2939_v13   ;;  %750 = vperm.xlu1 %2629, %v2942_v14   ;;  %v375_v29 = vpop.permute.xlu1 %374 }
  0xca   : > { %vm436_vm6 = vcmp.eq.s32.totalorder %v2995_v27, %v405_v25  ;;  %vm437_vm7 = vcmp.eq.s32.totalorder %v3003_v31, %v405_v25  ;;  %vm416_vm8 = vcmp.eq.s32.totalorder %v2995_v27, %v375_v29  ;;  %vm417_vm9 = vcmp.eq.s32.totalorder %v3003_v31, %v375_v29  ;;  %v381_v20 = vpop.permute.xlu0 %380 }
  0xcb   : > { %v2172_v37 = vsel %vm436_vm6, 1.0, %v2784_v34  ;;  %v2173_v28 = vsel %vm437_vm7, 1.0, %v2784_v34  ;;  %v2152_v38 = vsel %vm416_vm8, 1.0, %v2784_v34  ;;  %v2153_v39 = vsel %vm417_vm9, 1.0, %v2784_v34  ;;  %908 = vperm.xlu0 %2632, %v2918_v8  }
  0xcc   : > { %v3169_v43 = vadd.f32 %v2172_v37, %v2140_v60  ;;  %v3171_v44 = vadd.f32 %v2173_v28, %v2141_v24  ;;  %v3173_v46 = vadd.f32 %v2152_v38, %v2120_v23  ;;  %v3175_v47 = vadd.f32 %v2153_v39, %v2121_v19 }
  0xcd   : > { %vm420_vm12 = vcmp.eq.s32.totalorder %v2995_v27, %v381_v20  ;;  %vm421_vm13 = vcmp.eq.s32.totalorder %v3003_v31, %v381_v20  ;;  %v2130_v23 = vsel %vm250_vm14, 1.0, %v2784_v34  ;;  %v2131_v19 = vsel %vm251_vm15, 1.0, %v2784_v34 }
  0xce   : > { %v2156_v53 = vsel %vm420_vm12, 1.0, %v2784_v34  ;;  %v2157_v61 = vsel %vm421_vm13, 1.0, %v2784_v34  ;;  %vm252_vm6 = vcmp.eq.s32.totalorder %v2995_v27, %v2984_v22  ;;  %vm253_vm7 = vcmp.eq.s32.totalorder %v3003_v31, %v2984_v22 }
  0xcf   : > { %v3197_v21 = vadd.f32 %v2156_v53, %v2124_v48  ;;  %v3199_v62 = vadd.f32 %v2157_v61, %v2125_v52  ;;  %vm256_vm8 = vcmp.eq.s32.totalorder %v2995_v27, %v3041_v51  ;;  %vm257_vm9 = vcmp.eq.s32.totalorder %v3003_v31, %v3041_v51 }
  0xd0   : > { %v2132_v53 = vsel %vm252_vm6, 1.0, %v2784_v34  ;;  %v2133_v22 = vsel %vm253_vm7, 1.0, %v2784_v34 }
  0xd1   : > { %2631 = vset.pattern.permute.xlu2 %v2785_v45  ;;  %2630 = vset.pattern.permute.xlu1 %v2785_v45  ;;  %v384_v32 = vpop.permute.xlu1 %383 }
  0xd2   : > { %vm422_vm0 = vcmp.eq.s32.totalorder %v2995_v27, %v384_v32  ;;  %vm423_vm1 = vcmp.eq.s32.totalorder %v3003_v31, %v384_v32  ;;  %v390_v42 = vpop.permute.xlu0 %389  ;;  %v542_v60 = vpop.permute.xlu2 %541  ;;  %890 = vperm.xlu2 %2631, %v2909_v6   ;;  %887 = vperm.xlu1 %2630, %v2897_v2  }
  0xd3   : > { %v2158_v24 = vsel %vm422_vm0, 1.0, %v2784_v34  ;;  %v2159_v25 = vsel %vm423_vm1, 1.0, %v2784_v34  ;;  %vm426_vm2 = vcmp.eq.s32.totalorder %v2995_v27, %v390_v42  ;;  %vm427_vm3 = vcmp.eq.s32.totalorder %v3003_v31, %v390_v42  ;;  %917 = vperm.xlu0 %2632, %v2930_v11  }
  0xd4   : > { %v3214_v45 = vadd.f32 %v2158_v24, %v2126_v63  ;;  %v3216_v29 = vadd.f32 %v2159_v25, %v2127_v3  ;;  %v2162_v20 = vsel %vm426_vm2, 1.0, %v2784_v34  ;;  %v2163_v37 = vsel %vm427_vm3, 1.0, %v2784_v34 }
  0xd5   : > { %v3220_v28 = vadd.f32 %v2162_v20, %v2130_v23  ;;  %v3222_v38 = vadd.f32 %v2163_v37, %v2131_v19  ;;  %vm586_vm4 = vcmp.eq.s32.totalorder %v2995_v27, %v542_v60  ;;  %vm587_vm5 = vcmp.eq.s32.totalorder %v3003_v31, %v542_v60 }
  0xd6   : > { %v2178_v11 = vsel %vm586_vm4, 1.0, %v2784_v34  ;;  %v2179_v39 = vsel %vm587_vm5, 1.0, %v2784_v34  ;;  %v2136_v63 = vsel %vm256_vm8, 1.0, %v2784_v34  ;;  %v2137_v3 = vsel %vm257_vm9, 1.0, %v2784_v34 }
  0xd7   : > { %v3237_v48 = vadd.f32 %v2178_v11, %v3140_v17  ;;  %v3240_v52 = vadd.f32 %v2179_v39, %v3142_v18  ;;  %vm258_vm0 = vcmp.eq.s32.totalorder %v2995_v27, %v2993_v26  ;;  %vm259_vm1 = vcmp.eq.s32.totalorder %v3003_v31, %v2993_v26 }
  0xd9   : > { %v393_v61 = vpop.permute.xlu1 %392 }
  0xda   : > { %vm428_vm10 = vcmp.eq.s32.totalorder %v2995_v27, %v393_v61  ;;  %vm429_vm11 = vcmp.eq.s32.totalorder %v3003_v31, %v393_v61  ;;  %v399_v51 = vpop.permute.xlu0 %398  ;;  %v548_v32 = vpop.permute.xlu2 %547  ;;  %899 = vperm.xlu2 %2631, %v2891_v0   ;;  %896 = vperm.xlu1 %2630, %v2906_v5   ;;  %v2139_v61 = vsel %vm259_vm1, 1.0, %v2784_v34 }
  0xdb   : > { %v2164_v17 = vsel %vm428_vm10, 1.0, %v2784_v34  ;;  %v2165_v18 = vsel %vm429_vm11, 1.0, %v2784_v34  ;;  %vm432_vm12 = vcmp.eq.s32.totalorder %v2995_v27, %v399_v51  ;;  %vm433_vm13 = vcmp.eq.s32.totalorder %v3003_v31, %v399_v51  ;;  %926 = vperm.xlu0 %2632, %v2942_v14  }
  0xdc   : > { %v3255_v23 = vadd.f32 %v2164_v17, %v2132_v53  ;;  %v3257_v19 = vadd.f32 %v2165_v18, %v2133_v22  ;;  %v2168_v42 = vsel %vm432_vm12, 1.0, %v2784_v34  ;;  %v2169_v60 = vsel %vm433_vm13, 1.0, %v2784_v34 }
  0xdd   : > { %v3261_v24 = vadd.f32 %v2168_v42, %v2136_v63  ;;  %v3263_v25 = vadd.f32 %v2169_v60, %v2137_v3  ;;  %vm590_vm14 = vcmp.eq.s32.totalorder %v2995_v27, %v548_v32  ;;  %vm591_vm15 = vcmp.eq.s32.totalorder %v3003_v31, %v548_v32 }
  0xde   : > { %v2182_v20 = vsel %vm590_vm14, 1.0, %v2784_v34  ;;  %v2183_v37 = vsel %vm591_vm15, 1.0, %v2784_v34  ;;  %v2138_v22 = vsel %vm258_vm0, 1.0, %v2784_v34 }
  0xdf   : > { %v3274_v11 = vadd.f32 %v2182_v20, %v3035_v49  ;;  %v3277_v39 = vadd.f32 %v2183_v37, %v3037_v50  ;;  %v2786_v50 = vmov 5  }
  0xe1   : > { %v402_v53 = vpop.permute.xlu1 %401 }
  0xe2   : > { %vm434_vm2 = vcmp.eq.s32.totalorder %v2995_v27, %v402_v53  ;;  %vm435_vm3 = vcmp.eq.s32.totalorder %v3003_v31, %v402_v53  ;;  %v557_v63 = vpop.permute.xlu2 %556  ;;  %905 = vperm.xlu2 %2631, %v2921_v9   ;;  %902 = vperm.xlu1 %2630, %v2903_v4  }
  0xe3   : > { %v2170_v26 = vsel %vm434_vm2, 1.0, %v2784_v34  ;;  %v2171_v49 = vsel %vm435_vm3, 1.0, %v2784_v34  ;;  %vm596_vm4 = vcmp.eq.s32.totalorder %v2995_v27, %v557_v63  ;;  %vm597_vm5 = vcmp.eq.s32.totalorder %v3003_v31, %v557_v63  ;;  %2633 = vset.pattern.permute.xlu0 %v2786_v50  ;;  %v536_v3 = vpop.permute.xlu0 %535 }
  0xe4   : > { %v3290_v51 = vadd.f32 %v2170_v26, %v2138_v22  ;;  %v3292_v32 = vadd.f32 %v2171_v49, %v2139_v61  ;;  %v2188_v17 = vsel %vm596_vm4, 1.0, %v2784_v34  ;;  %v2189_v18 = vsel %vm597_vm5, 1.0, %v2784_v34  ;;  %1063 = vperm.xlu0 %2633, %v2897_v2  }
  0xe5   : > { %v3298_v42 = vadd.f32 %v2188_v17, %v3197_v21  ;;  %v3301_v60 = vadd.f32 %v2189_v18, %v3199_v62  ;;  %vm582_vm6 = vcmp.eq.s32.totalorder %v2995_v27, %v536_v3  ;;  %vm583_vm7 = vcmp.eq.s32.totalorder %v3003_v31, %v536_v3 }
  0xe6   : > { %v2174_v20 = vsel %vm582_vm6, 1.0, %v2784_v34  ;;  %v2175_v37 = vsel %vm583_vm7, 1.0, %v2784_v34 }
  0xe7   : > { %v3308_v53 = vadd.f32 %v2174_v20, %v3083_v35  ;;  %v3311_v22 = vadd.f32 %v2175_v37, %v3085_v36 }
  0xea   : > { %v566_v61 = vpop.permute.xlu2 %565  ;;  %914 = vperm.xlu2 %2631, %v2933_v12   ;;  %911 = vperm.xlu1 %2630, %v2915_v7   ;;  %v539_v21 = vpop.permute.xlu1 %538 }
  0xeb   : > { %vm602_vm8 = vcmp.eq.s32.totalorder %v2995_v27, %v566_v61  ;;  %vm603_vm9 = vcmp.eq.s32.totalorder %v3003_v31, %v566_v61  ;;  %vm584_vm10 = vcmp.eq.s32.totalorder %v2995_v27, %v539_v21  ;;  %vm585_vm11 = vcmp.eq.s32.totalorder %v3003_v31, %v539_v21  ;;  %v551_v62 = vpop.permute.xlu0 %550 }
  0xec   : > { %v2194_v35 = vsel %vm602_vm8, 1.0, %v2784_v34  ;;  %v2195_v36 = vsel %vm603_vm9, 1.0, %v2784_v34  ;;  %v2176_v63 = vsel %vm584_vm10, 1.0, %v2784_v34  ;;  %v2177_v26 = vsel %vm585_vm11, 1.0, %v2784_v34  ;;  %1078 = vperm.xlu0 %2633, %v2903_v4  }
  0xed   : > { %v3325_v49 = vadd.f32 %v2194_v35, %v3220_v28  ;;  %v3328_v3 = vadd.f32 %v2195_v36, %v3222_v38  ;;  %v3331_v17 = vadd.f32 %v2176_v63, %v3018_v40  ;;  %v3334_v18 = vadd.f32 %v2177_v26, %v3020_v41 }
  0xee   : > { %vm592_vm12 = vcmp.eq.s32.totalorder %v2995_v27, %v551_v62  ;;  %vm593_vm13 = vcmp.eq.s32.totalorder %v3003_v31, %v551_v62 }
  0xef   : > { %v2184_v20 = vsel %vm592_vm12, 1.0, %v2784_v34  ;;  %v2185_v4 = vsel %vm593_vm13, 1.0, %v2784_v34 }
  0xf0   : > { %v3341_v28 = vadd.f32 %v2184_v20, %v3173_v46  ;;  %v3344_v38 = vadd.f32 %v2185_v4, %v3175_v47 }
  0xf2   : > { %v575_v37 = vpop.permute.xlu2 %574  ;;  %923 = vperm.xlu2 %2631, %v2945_v15   ;;  %920 = vperm.xlu1 %2630, %v2927_v10   ;;  %v545_v40 = vpop.permute.xlu1 %544 }
  0xf3   : > { %vm608_vm14 = vcmp.eq.s32.totalorder %v2995_v27, %v575_v37  ;;  %vm609_vm15 = vcmp.eq.s32.totalorder %v3003_v31, %v575_v37  ;;  %vm588_vm0 = vcmp.eq.s32.totalorder %v2995_v27, %v545_v40  ;;  %vm589_vm1 = vcmp.eq.s32.totalorder %v3003_v31, %v545_v40  ;;  %v560_v41 = vpop.permute.xlu0 %559 }
  0xf4   : > { %v2200_v46 = vsel %vm608_vm14, 1.0, %v2784_v34  ;;  %v2201_v47 = vsel %vm609_vm15, 1.0, %v2784_v34  ;;  %v2180_v61 = vsel %vm588_vm0, 1.0, %v2784_v34  ;;  %v2181_v15 = vsel %vm589_vm1, 1.0, %v2784_v34  ;;  %1087 = vperm.xlu0 %2633, %v2915_v7  }
  0xf5   : > { %v3358_v21 = vadd.f32 %v2200_v46, %v3261_v24  ;;  %v3361_v62 = vadd.f32 %v2201_v47, %v3263_v25  ;;  %v684_v35 = vadd.f32 %v2180_v61, %v3120_v56  ;;  %v685_v36 = vadd.f32 %v2181_v15, %v3122_v57 }
  0xf6   : > { %vm598_vm2 = vcmp.eq.s32.totalorder %v2995_v27, %v560_v41  ;;  %vm599_vm3 = vcmp.eq.s32.totalorder %v3003_v31, %v560_v41 }
  0xf7   : > { %v2190_v63 = vsel %vm598_vm2, 1.0, %v2784_v34  ;;  %v2191_v26 = vsel %vm599_vm3, 1.0, %v2784_v34 }
  0xf8   : > { %v3370_v20 = vadd.f32 %v2190_v63, %v3214_v45  ;;  %v3373_v24 = vadd.f32 %v2191_v26, %v3216_v29  ;;  %v2787_v45 = vmov 6  }
  0xfa   : > { %932 = vperm.xlu2 %2631, %v2951_v16   ;;  %929 = vperm.xlu1 %2630, %v2939_v13   ;;  %v554_v56 = vpop.permute.xlu1 %553 }
  0xfb   : > { %vm594_vm4 = vcmp.eq.s32.totalorder %v2995_v27, %v554_v56  ;;  %vm595_vm5 = vcmp.eq.s32.totalorder %v3003_v31, %v554_v56  ;;  %v569_v57 = vpop.permute.xlu0 %568  ;;  %v712_v25 = vpop.permute.xlu2 %711 }
  0xfc   : > { %v2186_v4 = vsel %vm594_vm4, 1.0, %v2784_v34  ;;  %v2187_v37 = vsel %vm595_vm5, 1.0, %v2784_v34  ;;  %vm604_vm6 = vcmp.eq.s32.totalorder %v2995_v27, %v569_v57  ;;  %vm605_vm7 = vcmp.eq.s32.totalorder %v3003_v31, %v569_v57  ;;  %2637 = vset.pattern.permute.xlu0 %v2787_v45 }
  0xfd   : > { %v3385_v13 = vadd.f32 %v2186_v4, %v3052_v58  ;;  %v3388_v16 = vadd.f32 %v2187_v37, %v3054_v59  ;;  %v2196_v29 = vsel %vm604_vm6, 1.0, %v2784_v34  ;;  %v2197_v40 = vsel %vm605_vm7, 1.0, %v2784_v34  ;;  %1266 = vperm.xlu0 %2637, %v2933_v12  }
  0xfe   : > { %v3394_v41 = vadd.f32 %v2196_v29, %v3255_v23  ;;  %v3397_v46 = vadd.f32 %v2197_v40, %v3257_v19  ;;  %vm758_vm8 = vcmp.eq.s32.totalorder %v2995_v27, %v712_v25  ;;  %vm759_vm9 = vcmp.eq.s32.totalorder %v3003_v31, %v712_v25 }
  0xff   : > { %v2206_v58 = vsel %vm758_vm8, 1.0, %v2784_v34  ;;  %v2207_v59 = vsel %vm759_vm9, 1.0, %v2784_v34 }
 0x100   : > { %v3404_v47 = vadd.f32 %v2206_v58, %v3308_v53  ;;  %v3407_v61 = vadd.f32 %v2207_v59, %v3311_v22 }
 0x102   : > { %2635 = vset.pattern.permute.xlu2 %v2786_v50  ;;  %2634 = vset.pattern.permute.xlu1 %v2786_v50  ;;  %v563_v23 = vpop.permute.xlu1 %562 }
 0x103   : > { %vm600_vm10 = vcmp.eq.s32.totalorder %v2995_v27, %v563_v23  ;;  %vm601_vm11 = vcmp.eq.s32.totalorder %v3003_v31, %v563_v23  ;;  %v578_v19 = vpop.permute.xlu0 %577  ;;  %1069 = vperm.xlu2 %2635, %v2894_v1   ;;  %v721_v15 = vpop.permute.xlu2 %720  ;;  %1066 = vperm.xlu1 %2634, %v2909_v6  }
 0x104   : > { %v2192_v53 = vsel %vm600_vm10, 1.0, %v2784_v34  ;;  %v2193_v22 = vsel %vm601_vm11, 1.0, %v2784_v34  ;;  %vm610_vm12 = vcmp.eq.s32.totalorder %v2995_v27, %v578_v19  ;;  %vm611_vm13 = vcmp.eq.s32.totalorder %v3003_v31, %v578_v19 }
 0x105   : > { %v3420_v63 = vadd.f32 %v2192_v53, %v3079_v30  ;;  %v3423_v26 = vadd.f32 %v2193_v22, %v3081_v33  ;;  %v2202_v56 = vsel %vm610_vm12, 1.0, %v2784_v34  ;;  %v2203_v57 = vsel %vm611_vm13, 1.0, %v2784_v34  ;;  %1272 = vperm.xlu0 %2637, %v2927_v10  }
 0x106   : > { %v3429_v6 = vadd.f32 %v2202_v56, %v3290_v51  ;;  %v3432_v25 = vadd.f32 %v2203_v57, %v3292_v32  ;;  %vm764_vm14 = vcmp.eq.s32.totalorder %v2995_v27, %v721_v15  ;;  %vm765_vm15 = vcmp.eq.s32.totalorder %v3003_v31, %v721_v15 }
 0x107   : > { %v2212_v30 = vsel %vm764_vm14, 1.0, %v2784_v34  ;;  %v2213_v33 = vsel %vm765_vm15, 1.0, %v2784_v34 }
 0x108   : > { %v3438_v4 = vadd.f32 %v2212_v30, %v684_v35  ;;  %v3440_v37 = vadd.f32 %v2213_v33, %v685_v36 }
 0x10a   : > { %v572_v29 = vpop.permute.xlu1 %571 }
 0x10b   : > { %vm606_vm0 = vcmp.eq.s32.totalorder %v2995_v27, %v572_v29  ;;  %vm607_vm1 = vcmp.eq.s32.totalorder %v3003_v31, %v572_v29  ;;  %1075 = vperm.xlu2 %2635, %v2891_v0   ;;  %v727_v10 = vpop.permute.xlu2 %726  ;;  %1072 = vperm.xlu1 %2634, %v2906_v5   ;;  %v2788_v5 = vmov 7  }
 0x10c   : > { %v2198_v51 = vsel %vm606_vm0, 1.0, %v2784_v34  ;;  %v2199_v32 = vsel %vm607_vm1, 1.0, %v2784_v34  ;;  %vm768_vm2 = vcmp.eq.s32.totalorder %v2995_v27, %v727_v10  ;;  %vm769_vm3 = vcmp.eq.s32.totalorder %v3003_v31, %v727_v10  ;;  %v715_v35 = vpop.permute.xlu0 %714 }
 0x10d   : > { %v3451_v36 = vadd.f32 %v2198_v51, %v3116_v54  ;;  %v3454_v40 = vadd.f32 %v2199_v32, %v3118_v55  ;;  %v2216_v58 = vsel %vm768_vm2, 1.0, %v2784_v34  ;;  %v2217_v59 = vsel %vm769_vm3, 1.0, %v2784_v34  ;;  %2646 = vset.pattern.permute.xlu0 %v2788_v5 }
 0x10e   : > { %v3460_v23 = vadd.f32 %v2216_v58, %v3341_v28  ;;  %v3463_v19 = vadd.f32 %v2217_v59, %v3344_v38  ;;  %vm760_vm4 = vcmp.eq.s32.totalorder %v2995_v27, %v715_v35  ;;  %vm761_vm5 = vcmp.eq.s32.totalorder %v3003_v31, %v715_v35  ;;  %1415 = vperm.xlu0 %2646, %v2897_v2  }
 0x10f   : > { %v2208_v54 = vsel %vm760_vm4, 1.0, %v2784_v34  ;;  %v2209_v55 = vsel %vm761_vm5, 1.0, %v2784_v34 }
 0x110   : > { %v3471_v15 = vadd.f32 %v2208_v54, %v3331_v17  ;;  %v3474_v53 = vadd.f32 %v2209_v55, %v3334_v18 }
 0x112   : > { %v581_v28 = vpop.permute.xlu1 %580 }
 0x113   : > { %vm612_vm6 = vcmp.eq.s32.totalorder %v2995_v27, %v581_v28  ;;  %vm613_vm7 = vcmp.eq.s32.totalorder %v3003_v31, %v581_v28  ;;  %1084 = vperm.xlu2 %2635, %v2918_v8   ;;  %v736_v38 = vpop.permute.xlu2 %735  ;;  %1081 = vperm.xlu1 %2634, %v2921_v9  }
 0x114   : > { %v2204_v2 = vsel %vm612_vm6, 1.0, %v2784_v34  ;;  %v2205_v22 = vsel %vm613_vm7, 1.0, %v2784_v34  ;;  %vm774_vm8 = vcmp.eq.s32.totalorder %v2995_v27, %v736_v38  ;;  %vm775_vm9 = vcmp.eq.s32.totalorder %v3003_v31, %v736_v38  ;;  %v730_v17 = vpop.permute.xlu0 %729 }
 0x115   : > { %v3485_v18 = vadd.f32 %v2204_v2, %v3169_v43  ;;  %v3488_v56 = vadd.f32 %v2205_v22, %v3171_v44  ;;  %v2222_v8 = vsel %vm774_vm8, 1.0, %v2784_v34  ;;  %v2223_v57 = vsel %vm775_vm9, 1.0, %v2784_v34 }
 0x116   : > { %v3493_v9 = vadd.f32 %v2222_v8, %v3370_v20  ;;  %v3496_v30 = vadd.f32 %v2223_v57, %v3373_v24  ;;  %vm770_vm10 = vcmp.eq.s32.totalorder %v2995_v27, %v730_v17  ;;  %vm771_vm11 = vcmp.eq.s32.totalorder %v3003_v31, %v730_v17  ;;  %1421 = vperm.xlu0 %2646, %v2894_v1  }
 0x117   : > { %v2218_v43 = vsel %vm770_vm10, 1.0, %v2784_v34  ;;  %v2219_v44 = vsel %vm771_vm11, 1.0, %v2784_v34 }
 0x118   : > { %v3504_v33 = vadd.f32 %v2218_v43, %v3385_v13  ;;  %v3507_v29 = vadd.f32 %v2219_v44, %v3388_v16 }
 0x11b   : > { %2636 = vset.pattern.permute.xlu2 %v2787_v45  ;;  %v745_v20 = vpop.permute.xlu2 %744  ;;  %1090 = vperm.xlu1 %2634, %v2933_v12   ;;  %v718_v24 = vpop.permute.xlu1 %717 }
 0x11c   : > { %vm780_vm12 = vcmp.eq.s32.totalorder %v2995_v27, %v745_v20  ;;  %vm781_vm13 = vcmp.eq.s32.totalorder %v3003_v31, %v745_v20  ;;  %vm762_vm14 = vcmp.eq.s32.totalorder %v2995_v27, %v718_v24  ;;  %vm763_vm15 = vcmp.eq.s32.totalorder %v3003_v31, %v718_v24  ;;  %v739_v1 = vpop.permute.xlu0 %738  ;;  %1263 = vperm.xlu2 %2636, %v2915_v7   ;;  %v2670_v24 = vld [vmem:[%s2885_s6] sm:$0xff] }
 0x11d   : > { %v2228_v13 = vsel %vm780_vm12, 1.0, %v2784_v34  ;;  %v2229_v16 = vsel %vm781_vm13, 1.0, %v2784_v34  ;;  %v2210_v10 = vsel %vm762_vm14, 1.0, %v2784_v34  ;;  %v2211_v51 = vsel %vm763_vm15, 1.0, %v2784_v34 }
 0x11e   : > { %v3521_v32 = vadd.f32 %v2228_v13, %v3394_v41  ;;  %v3524_v35 = vadd.f32 %v2229_v16, %v3397_v46  ;;  %v3527_v58 = vadd.f32 %v2210_v10, %v3237_v48  ;;  %v3530_v59 = vadd.f32 %v2211_v51, %v3240_v52  ;;  %1427 = vperm.xlu0 %2646, %v2891_v0  }
 0x11f   : > { %vm776_vm0 = vcmp.eq.s32.totalorder %v2995_v27, %v739_v1  ;;  %vm777_vm1 = vcmp.eq.s32.totalorder %v3003_v31, %v739_v1  ;;  %v2671_v1 = vld [vmem:[%s2885_s6 + $0x8] sm:$0xff] }
 0x120   : > { %v2224_v54 = vsel %vm776_vm0, 1.0, %v2784_v34  ;;  %v2225_v41 = vsel %vm777_vm1, 1.0, %v2784_v34 }
 0x121   : > { %v3538_v55 = vadd.f32 %v2224_v54, %v3420_v63  ;;  %v3541_v46 = vadd.f32 %v2225_v41, %v3423_v26 }
 0x123   : > { %v754_v48 = vpop.permute.xlu2 %753  ;;  %2638 = vset.pattern.permute.xlu1 %v2788_v5  ;;  %v724_v52 = vpop.permute.xlu1 %723 }
 0x124   : > { %vm786_vm2 = vcmp.eq.s32.totalorder %v2995_v27, %v754_v48  ;;  %vm787_vm3 = vcmp.eq.s32.totalorder %v3003_v31, %v754_v48  ;;  %vm766_vm4 = vcmp.eq.s32.totalorder %v2995_v27, %v724_v52  ;;  %vm767_vm5 = vcmp.eq.s32.totalorder %v3003_v31, %v724_v52  ;;  %v748_v0 = vpop.permute.xlu0 %747  ;;  %2639 = vset.pattern.permute.xlu2 %v2788_v5 }
 0x125   : > { %v2234_v63 = vsel %vm786_vm2, 1.0, %v2784_v34  ;;  %v2235_v26 = vsel %vm787_vm3, 1.0, %v2784_v34  ;;  %v2214_v28 = vsel %vm766_vm4, 1.0, %v2784_v34  ;;  %v2215_v38 = vsel %vm767_vm5, 1.0, %v2784_v34  ;;  %1439 = vperm.xlu1 %2638, %v2915_v7   ;;  %1442 = vperm.xlu2 %2639, %v2933_v12  }
 0x126   : > { %v3556_v2 = vadd.f32 %v2234_v63, %v3429_v6  ;;  %v3559_v22 = vadd.f32 %v2235_v26, %v3432_v25  ;;  %v862_v17 = vadd.f32 %v2214_v28, %v3274_v11  ;;  %v863_v8 = vadd.f32 %v2215_v38, %v3277_v39  ;;  %2659 = vset.pattern.permute.xlu0 %v2787_v45  ;;  %v2673_v38 = vld [vmem:[%s2885_s6 + $0x50] sm:$0xff] }
 0x127   : > { %vm782_vm6 = vcmp.eq.s32.totalorder %v2995_v27, %v748_v0  ;;  %vm783_vm7 = vcmp.eq.s32.totalorder %v3003_v31, %v748_v0  ;;  %1278 = vperm.xlu0 %2659, %v2942_v14  }
 0x128   : > { %v2230_v7 = vsel %vm782_vm6, 1.0, %v2784_v34  ;;  %v2231_v12 = vsel %vm783_vm7, 1.0, %v2784_v34 }
 0x129   : > { %v3570_v6 = vadd.f32 %v2230_v7, %v3451_v36  ;;  %v3573_v25 = vadd.f32 %v2231_v12, %v3454_v40 }
 0x12b   : > { %v733_v11 = vpop.permute.xlu1 %732 }
 0x12c   : > { %vm772_vm8 = vcmp.eq.s32.totalorder %v2995_v27, %v733_v11  ;;  %vm773_vm9 = vcmp.eq.s32.totalorder %v3003_v31, %v733_v11  ;;  %v757_v39 = vpop.permute.xlu0 %756  ;;  %v891_v57 = vpop.permute.xlu2 %890 }
 0x12d   : > { %v2220_v14 = vsel %vm772_vm8, 1.0, %v2784_v34  ;;  %v2221_v43 = vsel %vm773_vm9, 1.0, %v2784_v34  ;;  %vm788_vm10 = vcmp.eq.s32.totalorder %v2995_v27, %v757_v39  ;;  %vm789_vm11 = vcmp.eq.s32.totalorder %v3003_v31, %v757_v39  ;;  %2640 = vset.pattern.permute.xlu1 %v2787_v45  ;;  %2641 = vset.pattern.permute.xlu2 %v2787_v45 }
 0x12e   : > { %v3584_v36 = vadd.f32 %v2220_v14, %v3298_v42  ;;  %v3587_v40 = vadd.f32 %v2221_v43, %v3301_v60  ;;  %v2236_v44 = vsel %vm788_vm10, 1.0, %v2784_v34  ;;  %v2237_v20 = vsel %vm789_vm11, 1.0, %v2784_v34  ;;  %1239 = vperm.xlu1 %2640, %v2670_v24   ;;  %1242 = vperm.xlu2 %2641, %v2671_v1   ;;  %v3602_v42 = vld [vmem:[%s2885_s6 + $0x78] sm:$0xff] }
 0x12f   : > { %v3594_v13 = vadd.f32 %v2236_v44, %v3485_v18  ;;  %v3597_v16 = vadd.f32 %v2237_v20, %v3488_v56  ;;  %vm936_vm12 = vcmp.eq.s32.totalorder %v2995_v27, %v891_v57  ;;  %vm937_vm13 = vcmp.eq.s32.totalorder %v3003_v31, %v891_v57  ;;  %1284 = vperm.xlu0 %2659, %v3602_v42  }
 0x130   : > { %v2240_v60 = vsel %vm936_vm12, 1.0, %v2784_v34  ;;  %v2241_v10 = vsel %vm937_vm13, 1.0, %v2784_v34 }
 0x131   : > { %v3608_v51 = vadd.f32 %v2240_v60, %v3471_v15  ;;  %v3611_v18 = vadd.f32 %v2241_v10, %v3474_v53 }
 0x133   : > { %v742_v56 = vpop.permute.xlu1 %741 }
 0x134   : > { %vm778_vm14 = vcmp.eq.s32.totalorder %v2995_v27, %v742_v56  ;;  %vm779_vm15 = vcmp.eq.s32.totalorder %v3003_v31, %v742_v56  ;;  %v900_v54 = vpop.permute.xlu2 %899 }
 0x135   : > { %v2226_v41 = vsel %vm778_vm14, 1.0, %v2784_v34  ;;  %v2227_v48 = vsel %vm779_vm15, 1.0, %v2784_v34  ;;  %vm942_vm0 = vcmp.eq.s32.totalorder %v2995_v27, %v900_v54  ;;  %vm943_vm1 = vcmp.eq.s32.totalorder %v3003_v31, %v900_v54  ;;  %v894_v15 = vpop.permute.xlu0 %893 }
 0x136   : > { %v874_v52 = vadd.f32 %v2226_v41, %v3325_v49  ;;  %v875_v53 = vadd.f32 %v2227_v48, %v3328_v3  ;;  %v2246_v0 = vsel %vm942_vm0, 1.0, %v2784_v34  ;;  %v2247_v63 = vsel %vm943_vm1, 1.0, %v2784_v34  ;;  %2642 = vset.pattern.permute.xlu1 %v2788_v5  ;;  %2643 = vset.pattern.permute.xlu2 %v2786_v50 }
 0x137   : > { %v3625_v26 = vadd.f32 %v2246_v0, %v862_v17  ;;  %v3627_v28 = vadd.f32 %v2247_v63, %v863_v8  ;;  %vm938_vm2 = vcmp.eq.s32.totalorder %v2995_v27, %v894_v15  ;;  %vm939_vm3 = vcmp.eq.s32.totalorder %v3003_v31, %v894_v15  ;;  %1418 = vperm.xlu1 %2642, %v2671_v1   ;;  %v3642_v8 = vld [vmem:[%s2885_s6 + $0x30] sm:$0xff]  ;;  %v2675_v1 = vld [vmem:[%s2885_s6 + $0x58] sm:$0xff] }
 0x138   : > { %v2242_v49 = vsel %vm938_vm2, 1.0, %v2784_v34  ;;  %v2243_v3 = vsel %vm939_vm3, 1.0, %v2784_v34  ;;  %1093 = vperm.xlu2 %2643, %v2673_v38   ;;  %2668 = vset.pattern.permute.xlu0 %v2788_v5 }
 0x139   : > { %v3636_v7 = vadd.f32 %v2242_v49, %v3527_v58  ;;  %v3639_v17 = vadd.f32 %v2243_v3, %v3530_v59  ;;  %1433 = vperm.xlu0 %2668, %v3642_v8  }
 0x13b   : > { %v751_v12 = vpop.permute.xlu1 %750 }
 0x13c   : > { %vm784_vm4 = vcmp.eq.s32.totalorder %v2995_v27, %v751_v12  ;;  %vm785_vm5 = vcmp.eq.s32.totalorder %v3003_v31, %v751_v12  ;;  %v906_v11 = vpop.permute.xlu2 %905 }
 0x13d   : > { %v2232_v39 = vsel %vm784_vm4, 1.0, %v2784_v34  ;;  %v2233_v57 = vsel %vm785_vm5, 1.0, %v2784_v34  ;;  %vm946_vm6 = vcmp.eq.s32.totalorder %v2995_v27, %v906_v11  ;;  %vm947_vm7 = vcmp.eq.s32.totalorder %v3003_v31, %v906_v11  ;;  %v909_v58 = vpop.permute.xlu0 %908 }
 0x13e   : > { %v880_v59 = vadd.f32 %v2232_v39, %v3358_v21  ;;  %v881_v14 = vadd.f32 %v2233_v57, %v3361_v62  ;;  %v2250_v43 = vsel %vm946_vm6, 1.0, %v2784_v34  ;;  %v2251_v44 = vsel %vm947_vm7, 1.0, %v2784_v34 }
 0x13f   : > { %v3656_v20 = vadd.f32 %v2250_v43, %v3504_v33  ;;  %v3659_v24 = vadd.f32 %v2251_v44, %v3507_v29  ;;  %vm948_vm8 = vcmp.eq.s32.totalorder %v2995_v27, %v909_v58  ;;  %vm949_vm9 = vcmp.eq.s32.totalorder %v3003_v31, %v909_v58  ;;  %2644 = vset.pattern.permute.xlu1 %v2786_v50 }
 0x140   : > { %v2252_v21 = vsel %vm948_vm8, 1.0, %v2784_v34  ;;  %v2253_v62 = vsel %vm949_vm9, 1.0, %v2784_v34  ;;  %2645 = vset.pattern.permute.xlu2 %v2787_v45  ;;  %1096 = vperm.xlu1 %2644, %v2675_v1  }
 0x141   : > { %v3669_v33 = vadd.f32 %v2252_v21, %v3584_v36  ;;  %v3672_v29 = vadd.f32 %v2253_v62, %v3587_v40  ;;  %1269 = vperm.xlu2 %2645, %v2673_v38  }
 0x144   : > { %v3674_v60 = vpop.permute.xlu2 %914  ;;  %v888_v10 = vpop.permute.xlu1 %887 }
 0x145   : > { %vm934_vm10 = vcmp.eq.s32.totalorder %v2995_v27, %v888_v10  ;;  %vm935_vm11 = vcmp.eq.s32.totalorder %v3003_v31, %v888_v10  ;;  %v918_v56 = vpop.permute.xlu0 %917 }
 0x146   : > { %v2238_v54 = vsel %vm934_vm10, 1.0, %v2784_v34  ;;  %v2239_v41 = vsel %vm935_vm11, 1.0, %v2784_v34  ;;  %vm954_vm12 = vcmp.eq.s32.totalorder %v2995_v27, %v918_v56  ;;  %vm955_vm13 = vcmp.eq.s32.totalorder %v3003_v31, %v918_v56 }
 0x147   : > { %v3681_v48 = vadd.f32 %v2238_v54, %v3404_v47  ;;  %v3684_v36 = vadd.f32 %v2239_v41, %v3407_v61  ;;  %v2258_v40 = vsel %vm954_vm12, 1.0, %v2784_v34  ;;  %v2259_v15 = vsel %vm955_vm13, 1.0, %v2784_v34 }
 0x148   : > { %2647 = vset.pattern.permute.xlu1 %v2788_v5  ;;  %v3692_v0 = vadd.f32 %v2258_v40, %v874_v52  ;;  %v3694_v47 = vadd.f32 %v2259_v15, %v875_v53  ;;  %v2678_v15 = vld [vmem:[%s2885_s6 + $0x60] sm:$0xff] }
 0x149   : > { %2648 = vset.pattern.permute.xlu2 %v2788_v5  ;;  %1445 = vperm.xlu1 %2647, %v2673_v38  }
 0x14a   : > { %1448 = vperm.xlu2 %2648, %v2675_v1  }
 0x14c   : > { %v924_v61 = vpop.permute.xlu2 %923  ;;  %v897_v63 = vpop.permute.xlu1 %896 }
 0x14d   : > { %vm958_vm14 = vcmp.eq.s32.totalorder %v2995_v27, %v924_v61  ;;  %vm959_vm15 = vcmp.eq.s32.totalorder %v3003_v31, %v924_v61  ;;  %vm940_vm0 = vcmp.eq.s32.totalorder %v2995_v27, %v897_v63  ;;  %vm941_vm1 = vcmp.eq.s32.totalorder %v3003_v31, %v897_v63  ;;  %v927_v49 = vpop.permute.xlu0 %926 }
 0x14e   : > { %v2262_v3 = vsel %vm958_vm14, 1.0, %v2784_v34  ;;  %v2263_v52 = vsel %vm959_vm15, 1.0, %v2784_v34  ;;  %v2244_v53 = vsel %vm940_vm0, 1.0, %v2784_v34  ;;  %v2245_v38 = vsel %vm941_vm1, 1.0, %v2784_v34 }
 0x14f   : > { %v3705_v12 = vadd.f32 %v2262_v3, %v3570_v6  ;;  %v3708_v11 = vadd.f32 %v2263_v52, %v3573_v25  ;;  %v3711_v39 = vadd.f32 %v2244_v53, %v3438_v4  ;;  %v3714_v57 = vadd.f32 %v2245_v38, %v3440_v37  ;;  %v2676_v4 = vld [vmem:[%s2885_s6 + $0x10] sm:$0xff]  ;;  %v2677_v37 = vld [vmem:[%s2885_s6 + $0x18] sm:$0xff] }
 0x150   : > { %vm960_vm2 = vcmp.eq.s32.totalorder %v2995_v27, %v927_v49  ;;  %vm961_vm3 = vcmp.eq.s32.totalorder %v3003_v31, %v927_v49  ;;  %v2485_v49 = vld [vmem:[%s4203_s1 + $0x78] sm:$0xff] }
 0x151   : > { %v2264_v58 = vsel %vm960_vm2, 1.0, %v2784_v34  ;;  %v2265_v43 = vsel %vm961_vm3, 1.0, %v2784_v34  ;;  %2649 = vset.pattern.permute.xlu1 %v2787_v45  ;;  %2503 = vmatpush.bf16.msra.mxu3 %v2485_v49 }
 0x152   : > { %v3721_v6 = vadd.f32 %v2264_v58, %v880_v59  ;;  %v3723_v25 = vadd.f32 %v2265_v43, %v881_v14  ;;  %2650 = vset.pattern.permute.xlu2 %v2787_v45  ;;  %1245 = vperm.xlu1 %2649, %v2676_v4   ;;  %v2476_v58 = vld [vmem:[%s4203_s1 + $0x30] sm:$0xff]  ;;  %v2679_v4 = vld [vmem:[%s2885_s6 + $0x68] sm:$0xff] }
 0x153   : > { %1248 = vperm.xlu2 %2650, %v2677_v37   ;;  %1783 = vmatpush.bf16.msra.mxu1 %v2485_v49 }
 0x154   : > { %v933_v44 = vpop.permute.xlu2 %932  ;;  %v903_v21 = vpop.permute.xlu1 %902 }
 0x155   : > { %vm964_vm4 = vcmp.eq.s32.totalorder %v2995_v27, %v933_v44  ;;  %vm965_vm5 = vcmp.eq.s32.totalorder %v3003_v31, %v933_v44  ;;  %vm944_vm6 = vcmp.eq.s32.totalorder %v2995_v27, %v903_v21  ;;  %vm945_vm7 = vcmp.eq.s32.totalorder %v3003_v31, %v903_v21 }
 0x156   : > { %v2268_v59 = vsel %vm964_vm4, 1.0, %v2784_v34  ;;  %v2269_v14 = vsel %vm965_vm5, 1.0, %v2784_v34  ;;  %v2248_v62 = vsel %vm944_vm6, 1.0, %v2784_v34  ;;  %v2249_v1 = vsel %vm945_vm7, 1.0, %v2784_v34  ;;  %v3736_v10 = vpop.permute.xlu0 %1063 }
 0x157   : > { %v3739_v56 = vadd.f32 %v2268_v59, %v3594_v13  ;;  %v3742_v54 = vadd.f32 %v2269_v14, %v3597_v16  ;;  %v1040_v41 = vadd.f32 %v2248_v62, %v3460_v23  ;;  %v1041_v40 = vadd.f32 %v2249_v1, %v3463_v19  ;;  %v2477_v19 = vld [vmem:[%s4203_s1 + $0x38] sm:$0xff] }
 0x158   : > { %2495 = vmatpush.bf16.msra.mxu2 %v2477_v19  ;;  %1734 = vmatpush.bf16.msra.mxu0 %v2477_v19 }
 0x15a   : > { %2651 = vset.pattern.permute.xlu1 %v2788_v5 }
 0x15b   : > { %2652 = vset.pattern.permute.xlu2 %v2786_v50  ;;  %1424 = vperm.xlu1 %2651, %v2677_v37  }
 0x15c   : > { %1099 = vperm.xlu2 %2652, %v2678_v15   ;;  %v3749_v61 = vpop.permute.xlu1 %911  ;;  %2496 = vmatpush.bf16.msra.mxu2 %v2476_v58 }
 0x15d   : > { %v1070_v63 = vpop.permute.xlu2 %1069  ;;  %1735 = vmatpush.bf16.msra.mxu0 %v2476_v58  ;;  %v2473_v58 = vld [vmem:[%s4203_s1 + $0x18] sm:$0xff] }
 0x15e   : > { %vm1114_vm8 = vcmp.eq.s32.totalorder %v2995_v27, %v1070_v63  ;;  %vm1115_vm9 = vcmp.eq.s32.totalorder %v3003_v31, %v1070_v63  ;;  %v1079_v13 = vpop.permute.xlu0 %1078  ;;  %v2483_v63 = vld [vmem:[%s4203_s1 + $0x68] sm:$0xff] }
 0x15f   : > { %v2274_v16 = vsel %vm1114_vm8, 1.0, %v2784_v34  ;;  %v2275_v23 = vsel %vm1115_vm9, 1.0, %v2784_v34  ;;  %vm1120_vm10 = vcmp.eq.s32.totalorder %v2995_v27, %v1079_v13  ;;  %vm1121_vm11 = vcmp.eq.s32.totalorder %v3003_v31, %v1079_v13 }
 0x160   : > { %v3762_v3 = vadd.f32 %v2274_v16, %v3636_v7  ;;  %v3765_v52 = vadd.f32 %v2275_v23, %v3639_v17  ;;  %v2280_v53 = vsel %vm1120_vm10, 1.0, %v2784_v34  ;;  %v2281_v38 = vsel %vm1121_vm11, 1.0, %v2784_v34  ;;  %v2484_v17 = vld [vmem:[%s4203_s1 + $0x70] sm:$0xff]  ;;  %v2482_v16 = vld [vmem:[%s4203_s1 + $0x60] sm:$0xff] }
 0x161   : > { %v3774_v7 = vadd.f32 %v2280_v53, %v1040_v41  ;;  %v3776_v43 = vadd.f32 %v2281_v38, %v1041_v40  ;;  %2504 = vmatpush.bf16.msra.mxu3 %v2484_v17  ;;  %v2475_v40 = vld [vmem:[%s4203_s1 + $0x28] sm:$0xff]  ;;  %1784 = vmatpush.bf16.msra.mxu1 %v2484_v17  ;;  %v2481_v17 = vld [vmem:[%s4203_s1 + $0x58] sm:$0xff]  ;;  %vm952_vm8 = vcmp.eq.s32.totalorder %v2995_v27, %v3674_v60 }
 0x162   : > { %2497 = vmatpush.bf16.msra.mxu2 %v2475_v40  ;;  %1736 = vmatpush.bf16.msra.mxu0 %v2475_v40  ;;  %v2478_v40 = vld [vmem:[%s4203_s1 + $0x40] sm:$0xff]  ;;  %vm953_vm9 = vcmp.eq.s32.totalorder %v3003_v31, %v3674_v60  ;;  %vm950_vm10 = vcmp.eq.s32.totalorder %v2995_v27, %v3749_v61  ;;  %vm951_vm11 = vcmp.eq.s32.totalorder %v3003_v31, %v3749_v61 }
 0x163   : > { %2653 = vset.pattern.permute.xlu1 %v2786_v50  ;;  %v2254_v61 = vsel %vm950_vm10, 1.0, %v2784_v34 }
 0x164   : > { %2654 = vset.pattern.permute.xlu2 %v2787_v45  ;;  %1102 = vperm.xlu1 %2653, %v2679_v4   ;;  %v921_v37 = vpop.permute.xlu1 %920 }
 0x165   : > { %1275 = vperm.xlu2 %2654, %v2678_v15   ;;  %vm956_vm12 = vcmp.eq.s32.totalorder %v2995_v27, %v921_v37  ;;  %vm957_vm13 = vcmp.eq.s32.totalorder %v3003_v31, %v921_v37  ;;  %v1076_v44 = vpop.permute.xlu2 %1075  ;;  %2505 = vmatpush.bf16.msra.mxu3 %v2483_v63  ;;  %v2480_v37 = vld [vmem:[%s4203_s1 + $0x50] sm:$0xff] }
 0x166   : > { %v2260_v21 = vsel %vm956_vm12, 1.0, %v2784_v34  ;;  %v2261_v59 = vsel %vm957_vm13, 1.0, %v2784_v34  ;;  %vm1118_vm14 = vcmp.eq.s32.totalorder %v2995_v27, %v1076_v44  ;;  %vm1119_vm15 = vcmp.eq.s32.totalorder %v3003_v31, %v1076_v44  ;;  %1785 = vmatpush.bf16.msra.mxu1 %v2483_v63  ;;  %v2681_v44 = vld [vmem:[%s2885_s6 + $0x28] sm:$0xff] }
 0x167   : > { %v3791_v14 = vadd.f32 %v2260_v21, %v3521_v32  ;;  %v3794_v62 = vadd.f32 %v2261_v59, %v3524_v35  ;;  %v2278_v1 = vsel %vm1118_vm14, 1.0, %v2784_v34  ;;  %v2279_v41 = vsel %vm1119_vm15, 1.0, %v2784_v34  ;;  %v2474_v35 = vld [vmem:[%s4203_s1 + $0x20] sm:$0xff]  ;;  %v2471_v21 = vld [vmem:[%s4203_s1 + $0x8] sm:$0xff] }
 0x168   : > { %v3805_v13 = vadd.f32 %v2278_v1, %v3625_v26  ;;  %v3808_v32 = vadd.f32 %v2279_v41, %v3627_v28  ;;  %2498 = vmatpush.bf16.msra.mxu2 %v2474_v35  ;;  %1737 = vmatpush.bf16.msra.mxu0 %v2474_v35  ;;  %v2479_v59 = vld [vmem:[%s4203_s1 + $0x48] sm:$0xff]  ;;  %v2470_v41 = vld [vmem:[%s4203_s1] sm:$0xff] }
 0x169   : > { %2506 = vmatpush.bf16.msra.mxu3 %v2482_v16 }
 0x16a   : > { %1786 = vmatpush.bf16.msra.mxu1 %v2482_v16 }
 0x16c   : > { %2655 = vset.pattern.permute.xlu1 %v2788_v5  ;;  %v930_v23 = vpop.permute.xlu1 %929  ;;  %2499 = vmatpush.bf16.msra.mxu2 %v2473_v58 }
 0x16d   : > { %2656 = vset.pattern.permute.xlu2 %v2788_v5  ;;  %1451 = vperm.xlu1 %2655, %v2678_v15   ;;  %vm962_vm0 = vcmp.eq.s32.totalorder %v2995_v27, %v930_v23  ;;  %vm963_vm1 = vcmp.eq.s32.totalorder %v3003_v31, %v930_v23  ;;  %v1085_v26 = vpop.permute.xlu2 %1084 }
 0x16e   : > { %v2266_v28 = vsel %vm962_vm0, 1.0, %v2784_v34  ;;  %v2267_v19 = vsel %vm963_vm1, 1.0, %v2784_v34  ;;  %1454 = vperm.xlu2 %2656, %v2679_v4   ;;  %vm1124_vm2 = vcmp.eq.s32.totalorder %v2995_v27, %v1085_v26  ;;  %vm1125_vm3 = vcmp.eq.s32.totalorder %v3003_v31, %v1085_v26  ;;  %2507 = vmatpush.bf16.msra.mxu3 %v2481_v17  ;;  %v2472_v4 = vld [vmem:[%s4203_s1 + $0x10] sm:$0xff] }
 0x16f   : > { %v3825_v49 = vadd.f32 %v2266_v28, %v3556_v2  ;;  %v3828_v15 = vadd.f32 %v2267_v19, %v3559_v22  ;;  %v2284_v53 = vsel %vm1124_vm2, 1.0, %v2784_v34  ;;  %v2285_v38 = vsel %vm1125_vm3, 1.0, %v2784_v34  ;;  %1738 = vmatpush.bf16.msra.mxu0 %v2473_v58  ;;  %1787 = vmatpush.bf16.msra.mxu1 %v2481_v17  ;;  %v2682_v26 = vld [vmem:[%s2885_s6 + $0x70] sm:$0xff]  ;;  %v1088_v28 = vpop.permute.xlu0 %1087 }
 0x170   : > { %v3839_v2 = vadd.f32 %v2284_v53, %v3669_v33  ;;  %v3842_v22 = vadd.f32 %v2285_v38, %v3672_v29  ;;  %v2680_v29 = vld [vmem:[%s2885_s6 + $0x20] sm:$0xff]  ;;  %2500 = vmatpush.bf16.msra.mxu2 %v2472_v4  ;;  %v2256_v17 = vsel %vm952_vm8, 1.0, %v2784_v34  ;;  %vm1126_vm15 = vcmp.eq.s32.totalorder %v2995_v27, %v1088_v28 }
 0x171   : > { %vm1127_vm0 = vcmp.eq.s32.totalorder %v3003_v31, %v1088_v28  ;;  %vm1110_vm8 = vcmp.eq.s32.totalorder %v2995_v27, %v3736_v10 }
 0x172   : > { %2508 = vmatpush.bf16.msra.mxu3 %v2480_v37 }
 0x173   : > { %1739 = vmatpush.bf16.msra.mxu0 %v2472_v4  ;;  %1788 = vmatpush.bf16.msra.mxu1 %v2480_v37 }
 0x174   : > { %2501 = vmatpush.bf16.msra.mxu2 %v2471_v21 }
 0x175   : > { %2657 = vset.pattern.permute.xlu1 %v2787_v45  ;;  %v3851_v33 = vpop.permute.xlu1 %1066 }
 0x176   : > { %2658 = vset.pattern.permute.xlu2 %v2787_v45  ;;  %1251 = vperm.xlu1 %2657, %v2680_v29   ;;  %v1264_v19 = vpop.permute.xlu2 %1263  ;;  %vm1112_vm10 = vcmp.eq.s32.totalorder %v2995_v27, %v3851_v33 }
 0x177   : > { %1254 = vperm.xlu2 %2658, %v2681_v44   ;;  %2509 = vmatpush.bf16.msra.mxu3 %v2479_v59  ;;  %vm1302_vm2 = vcmp.eq.s32.totalorder %v2995_v27, %v1264_v19  ;;  %vm1303_vm3 = vcmp.eq.s32.totalorder %v3003_v31, %v1264_v19 }
 0x178   : > { %1740 = vmatpush.bf16.msra.mxu0 %v2471_v21  ;;  %1789 = vmatpush.bf16.msra.mxu1 %v2479_v59  ;;  %v2319_v28 = vsel %vm1303_vm3, 1.0, %v2784_v34 }
 0x179   : > { %2502 = vmatpush.bf16.msra.mxu2 %v2470_v41 }
 0x17b   : > { %2510 = vmatpush.bf16.msra.mxu3 %v2478_v40 }
 0x17c   : > { %1741 = vmatpush.bf16.msra.mxu0 %v2470_v41  ;;  %1790 = vmatpush.bf16.msra.mxu1 %v2478_v40  ;;  %v2287_v41 = vsel %vm1127_vm0, 1.0, %v2784_v34 }
 0x17d   : > { %v1073_v1 = vpop.permute.xlu1 %1072 }
 0x17e   : > { %2660 = vset.pattern.permute.xlu1 %v2788_v5  ;;  %vm1116_vm4 = vcmp.eq.s32.totalorder %v2995_v27, %v1073_v1  ;;  %vm1117_vm5 = vcmp.eq.s32.totalorder %v3003_v31, %v1073_v1  ;;  %v2286_v1 = vsel %vm1126_vm15, 1.0, %v2784_v34 }
 0x17f   : > { %v2276_v63 = vsel %vm1116_vm4, 1.0, %v2784_v34  ;;  %v2277_v35 = vsel %vm1117_vm5, 1.0, %v2784_v34  ;;  %2661 = vset.pattern.permute.xlu2 %v2786_v50  ;;  %1430 = vperm.xlu1 %2660, %v2681_v44   ;;  %v1443_v4 = vpop.permute.xlu2 %1442 }
 0x180   : > { %v3875_v16 = vadd.f32 %v2276_v63, %v3711_v39  ;;  %v3878_v23 = vadd.f32 %v2277_v35, %v3714_v57  ;;  %1105 = vperm.xlu2 %2661, %v2682_v26   ;;  %vm1480_vm4 = vcmp.eq.s32.totalorder %v2995_v27, %v1443_v4  ;;  %v1046_v63 = vadd.f32 %v2254_v61, %v3493_v9 }
 0x181   : > { %vm1481_vm5 = vcmp.eq.s32.totalorder %v3003_v31, %v1443_v4 }
 0x185   : > { %v1082_v53 = vpop.permute.xlu1 %1081 }
 0x186   : > { %vm1122_vm6 = vcmp.eq.s32.totalorder %v2995_v27, %v1082_v53  ;;  %vm1123_vm7 = vcmp.eq.s32.totalorder %v3003_v31, %v1082_v53 }
 0x187   : > { %v2282_v38 = vsel %vm1122_vm6, 1.0, %v2784_v34  ;;  %v2283_v39 = vsel %vm1123_vm7, 1.0, %v2784_v34  ;;  %2662 = vset.pattern.permute.xlu1 %v2786_v50  ;;  %v1267_v50 = vpop.permute.xlu0 %1266 }
 0x188   : > { %v3887_v57 = vadd.f32 %v2282_v38, %v3656_v20  ;;  %v3890_v58 = vadd.f32 %v2283_v39, %v3659_v24  ;;  %2663 = vset.pattern.permute.xlu2 %v2787_v45  ;;  %1108 = vperm.xlu1 %2662, %v3602_v42   ;;  %v2257_v20 = vsel %vm953_vm9, 1.0, %v2784_v34  ;;  %v1048_v24 = vadd.f32 %v2256_v17, %v3538_v55 }
 0x189   : > { %1281 = vperm.xlu2 %2663, %v2682_v26   ;;  %vm1304_vm14 = vcmp.eq.s32.totalorder %v2995_v27, %v1267_v50  ;;  %v1049_v44 = vadd.f32 %v2257_v20, %v3541_v46  ;;  %vm1305_vm1 = vcmp.eq.s32.totalorder %v3003_v31, %v1267_v50  ;;  %v2255_v55 = vsel %vm951_vm11, 1.0, %v2784_v34  ;;  %v1243_v50 = vpop.permute.xlu2 %1242 }
 0x18a   : > { %v2320_v59 = vsel %vm1304_vm14, 1.0, %v2784_v34  ;;  %v2321_v40 = vsel %vm1305_vm1, 1.0, %v2784_v34  ;;  %v1047_v35 = vadd.f32 %v2255_v55, %v3496_v30  ;;  %v2352_v38 = vsel %vm1480_vm4, 1.0, %v2784_v34  ;;  %v2683_v55 = vld [vmem:[%s2885_s6 + $0x38] sm:$0xff] }
 0x18b   : > { %v2353_v17 = vsel %vm1481_vm5, 1.0, %v2784_v34  ;;  %vm1111_vm9 = vcmp.eq.s32.totalorder %v3003_v31, %v3736_v10  ;;  %vm1113_vm11 = vcmp.eq.s32.totalorder %v3003_v31, %v3851_v33  ;;  %vm1288_vm14 = vcmp.eq.s32.totalorder %v2995_v27, %v1243_v50 }
 0x18c   : > { %v1223_v53 = vadd.f32 %v2287_v41, %v1047_v35  ;;  %vm1289_vm15 = vcmp.eq.s32.totalorder %v3003_v31, %v1243_v50  ;;  %v2272_v10 = vsel %vm1112_vm10, 1.0, %v2784_v34  ;;  %v2273_v33 = vsel %vm1113_vm11, 1.0, %v2784_v34 }
 0x18d   : > { %v1091_v37 = vpop.permute.xlu1 %1090 }
 0x18e   : > { %vm1128_vm12 = vcmp.eq.s32.totalorder %v2995_v27, %v1091_v37  ;;  %vm1129_vm13 = vcmp.eq.s32.totalorder %v3003_v31, %v1091_v37  ;;  %v1399_v37 = vadd.f32 %v2319_v28, %v1223_v53  ;;  %v2305_v28 = vsel %vm1289_vm15, 1.0, %v2784_v34 }
 0x18f   : > { %v2288_v60 = vsel %vm1128_vm12, 1.0, %v2784_v34  ;;  %v2289_v29 = vsel %vm1129_vm13, 1.0, %v2784_v34 }
 0x190   : > { %2664 = vset.pattern.permute.xlu1 %v2788_v5  ;;  %v1224_v21 = vadd.f32 %v2288_v60, %v1048_v24  ;;  %v1225_v46 = vadd.f32 %v2289_v29, %v1049_v44  ;;  %v3938_v24 = vpop.permute.xlu0 %1272 }
 0x191   : > { %2665 = vset.pattern.permute.xlu2 %v2788_v5  ;;  %1457 = vperm.xlu1 %2664, %v2682_v26   ;;  %v2318_v26 = vsel %vm1302_vm2, 1.0, %v2784_v34  ;;  %vm1308_vm4 = vcmp.eq.s32.totalorder %v2995_v27, %v3938_v24  ;;  %vm1309_vm5 = vcmp.eq.s32.totalorder %v3003_v31, %v3938_v24 }
 0x192   : > { %1460 = vperm.xlu2 %2665, %v3602_v42   ;;  %v1400_v19 = vadd.f32 %v2320_v59, %v1224_v21  ;;  %v1222_v42 = vadd.f32 %v2286_v1, %v1046_v63  ;;  %v1401_v39 = vadd.f32 %v2321_v40, %v1225_v46  ;;  %v1094_v1 = vpop.permute.xlu2 %1093 }
 0x194   : > { %v1398_v9 = vadd.f32 %v2318_v26, %v1222_v42  ;;  %v1576_v60 = vadd.f32 %v2352_v38, %v1400_v19  ;;  %v1577_v61 = vadd.f32 %v2353_v17, %v1401_v39  ;;  %v2304_v26 = vsel %vm1288_vm14, 1.0, %v2784_v34 }
 0x195   : > { %v1208_v19 = vadd.f32 %v2272_v10, %v3608_v51  ;;  %v1209_v42 = vadd.f32 %v2273_v33, %v3611_v18 }
 0x197   : > { %v1440_v20 = vpop.permute.xlu1 %1439  ;;  %v1385_v50 = vadd.f32 %v2305_v28, %v1209_v42 }
 0x198   : > { %vm1478_vm6 = vcmp.eq.s32.totalorder %v2995_v27, %v1440_v20  ;;  %vm1479_vm7 = vcmp.eq.s32.totalorder %v3003_v31, %v1440_v20  ;;  %v1416_v41 = vpop.permute.xlu0 %1415 }
 0x199   : > { %v2350_v30 = vsel %vm1478_vm6, 1.0, %v2784_v34  ;;  %v2351_v4 = vsel %vm1479_vm7, 1.0, %v2784_v34  ;;  %2666 = vset.pattern.permute.xlu1 %v2787_v45  ;;  %vm1462_vm0 = vcmp.eq.s32.totalorder %v2995_v27, %v1416_v41  ;;  %vm1463_vm1 = vcmp.eq.s32.totalorder %v3003_v31, %v1416_v41 }
 0x19a   : > { %2667 = vset.pattern.permute.xlu2 %v2787_v45  ;;  %1257 = vperm.xlu1 %2666, %v3642_v8   ;;  %v1574_v29 = vadd.f32 %v2350_v30, %v1398_v9  ;;  %v1575_v44 = vadd.f32 %v2351_v4, %v1399_v37  ;;  %v2270_v45 = vsel %vm1110_vm8, 1.0, %v2784_v34  ;;  %v2271_v8 = vsel %vm1111_vm9, 1.0, %v2784_v34 }
 0x19b   : > { %1260 = vperm.xlu2 %2667, %v2683_v55   ;;  %v1207_v35 = vadd.f32 %v2271_v8, %v3684_v36  ;;  %v2334_v39 = vsel %vm1462_vm0, 1.0, %v2784_v34  ;;  %v1384_v36 = vadd.f32 %v2304_v26, %v1208_v19  ;;  %v1270_v20 = vpop.permute.xlu2 %1269  ;;  %vm1130_vm8 = vcmp.eq.s32.totalorder %v2995_v27, %v1094_v1 }
 0x19c   : > { %v1598_v21 = vpack.c.bf16 %v1576_v60, %v1574_v29  ;;  %v1599_v46 = vpack.c.bf16 %v1577_v61, %v1575_v44  ;;  %vm1131_vm9 = vcmp.eq.s32.totalorder %v3003_v31, %v1094_v1  ;;  %vm1306_vm10 = vcmp.eq.s32.totalorder %v2995_v27, %v1270_v20 }
 0x19d   : > { %vm1307_vm11 = vcmp.eq.s32.totalorder %v3003_v31, %v1270_v20  ;;  %v2324_v8 = vsel %vm1308_vm4, 1.0, %v2784_v34  ;;  %v2325_v1 = vsel %vm1309_vm5, 1.0, %v2784_v34  ;;  %v2322_v41 = vsel %vm1306_vm10, 1.0, %v2784_v34 }
 0x19e   : > { %1762 = vmatmul.bf16.vlgmr.msra.gmra.mxu2 %v1598_v21  ;;  %1811 = vmatmul.bf16.vlgmr.msra.gmra.mxu3 %v1599_v46  ;;  %v2323_v10 = vsel %vm1307_vm11, 1.0, %v2784_v34 }
 0x1a0   : > { %v1240_v59 = vpop.permute.xlu1 %1239 }
 0x1a1   : > { %vm1286_vm12 = vcmp.eq.s32.totalorder %v2995_v27, %v1240_v59  ;;  %vm1287_vm13 = vcmp.eq.s32.totalorder %v3003_v31, %v1240_v59  ;;  %v2290_v59 = vsel %vm1130_vm8, 1.0, %v2784_v34 }
 0x1a2   : > { %2669 = vset.pattern.permute.xlu1 %v2788_v5  ;;  %v2302_v40 = vsel %vm1286_vm12, 1.0, %v2784_v34  ;;  %v2303_v63 = vsel %vm1287_vm13, 1.0, %v2784_v34  ;;  %v1206_v5 = vadd.f32 %v2270_v45, %v3681_v48  ;;  %v2335_v48 = vsel %vm1463_vm1, 1.0, %v2784_v34 }
 0x1a3   : > { %1436 = vperm.xlu1 %2669, %v2683_v55   ;;  %v1383_v38 = vadd.f32 %v2303_v63, %v1207_v35  ;;  %v2291_v45 = vsel %vm1131_vm9, 1.0, %v2784_v34 }
 0x1a4   : > { %v1382_v53 = vadd.f32 %v2302_v40, %v1206_v5  ;;  %v1449_v61 = vpop.permute.xlu2 %1448 }
 0x1a5   : > { %v1559_v30 = vadd.f32 %v2335_v48, %v1383_v38  ;;  %vm1484_vm12 = vcmp.eq.s32.totalorder %v2995_v27, %v1449_v61  ;;  %vm1485_vm13 = vcmp.eq.s32.totalorder %v3003_v31, %v1449_v61 }
 0x1a6   : > { %v1558_v37 = vadd.f32 %v2334_v39, %v1382_v53  ;;  %v2356_v63 = vsel %vm1484_vm12, 1.0, %v2784_v34  ;;  %v2357_v5 = vsel %vm1485_vm13, 1.0, %v2784_v34 }
 0x1a9   : > { %v1419_v17 = vpop.permute.xlu1 %1418 }
 0x1aa   : > { %vm1464_vm2 = vcmp.eq.s32.totalorder %v2995_v27, %v1419_v17  ;;  %vm1465_vm3 = vcmp.eq.s32.totalorder %v3003_v31, %v1419_v17 }
 0x1ab   : > { %v2336_v9 = vsel %vm1464_vm2, 1.0, %v2784_v34  ;;  %v2337_v51 = vsel %vm1465_vm3, 1.0, %v2784_v34 }
 0x1ac   : > { %v1560_v18 = vadd.f32 %v2336_v9, %v1384_v36  ;;  %v1561_v4 = vadd.f32 %v2337_v51, %v1385_v50  ;;  %v1422_v36 = vpop.permute.xlu0 %1421 }
 0x1ad   : > { %v1249_v19 = vpop.permute.xlu2 %1248  ;;  %vm1466_vm4 = vcmp.eq.s32.totalorder %v2995_v27, %v1422_v36  ;;  %vm1467_vm5 = vcmp.eq.s32.totalorder %v3003_v31, %v1422_v36 }
 0x1ae   : > { %v1590_v60 = vpack.c.bf16 %v1560_v18, %v1558_v37  ;;  %v1591_v29 = vpack.c.bf16 %v1561_v4, %v1559_v30  ;;  %vm1292_vm2 = vcmp.eq.s32.totalorder %v2995_v27, %v1249_v19  ;;  %vm1293_vm3 = vcmp.eq.s32.totalorder %v3003_v31, %v1249_v19 }
 0x1af   : > { %v2308_v37 = vsel %vm1292_vm2, 1.0, %v2784_v34  ;;  %v2309_v18 = vsel %vm1293_vm3, 1.0, %v2784_v34 }
 0x1b0   : > { %1742 = vmatmul.bf16.vlgmr.msra.gmra.mxu0 %v1590_v60  ;;  %1791 = vmatmul.bf16.vlgmr.msra.gmra.mxu1 %v1591_v29  ;;  %v2338_v29 = vsel %vm1466_vm4, 1.0, %v2784_v34 }
 0x1b2   : > { %v1097_v44 = vpop.permute.xlu1 %1096 }
 0x1b3   : > { %vm1132_vm6 = vcmp.eq.s32.totalorder %v2995_v27, %v1097_v44  ;;  %vm1133_vm7 = vcmp.eq.s32.totalorder %v3003_v31, %v1097_v44  ;;  %v2339_v44 = vsel %vm1467_vm5, 1.0, %v2784_v34 }
 0x1b4   : > { %v2292_v55 = vsel %vm1132_vm6, 1.0, %v2784_v34  ;;  %v2293_v21 = vsel %vm1133_vm7, 1.0, %v2784_v34  ;;  %v4016_v30 = vpop.permute.xlu0 %1427 }
 0x1b5   : > { %v1228_v46 = vadd.f32 %v2292_v55, %v3791_v14  ;;  %v1229_v24 = vadd.f32 %v2293_v21, %v3794_v62  ;;  %v1226_v14 = vadd.f32 %v2290_v59, %v3692_v0  ;;  %v1227_v62 = vadd.f32 %v2291_v45, %v3694_v47 }
 0x1b6   : > { %v1100_v20 = vpop.permute.xlu2 %1099  ;;  %v1388_v55 = vadd.f32 %v2308_v37, %v3875_v16  ;;  %v1389_v21 = vadd.f32 %v2309_v18, %v3878_v23 }
 0x1b7   : > { %v1404_v33 = vadd.f32 %v2324_v8, %v1228_v46  ;;  %v1405_v40 = vadd.f32 %v2325_v1, %v1229_v24  ;;  %v1402_v26 = vadd.f32 %v2322_v41, %v1226_v14  ;;  %v1403_v28 = vadd.f32 %v2323_v10, %v1227_v62 }
 0x1b8   : > { %vm1134_vm8 = vcmp.eq.s32.totalorder %v2995_v27, %v1100_v20  ;;  %vm1135_vm9 = vcmp.eq.s32.totalorder %v3003_v31, %v1100_v20 }
 0x1b9   : > { %v1580_v47 = vadd.f32 %v2356_v63, %v1404_v33  ;;  %v1581_v39 = vadd.f32 %v2357_v5, %v1405_v40  ;;  %v2294_v63 = vsel %vm1134_vm8, 1.0, %v2784_v34  ;;  %v2295_v5 = vsel %vm1135_vm9, 1.0, %v2784_v34 }
 0x1ba   : > { %vm1470_vm8 = vcmp.eq.s32.totalorder %v2995_v27, %v4016_v30  ;;  %vm1471_vm9 = vcmp.eq.s32.totalorder %v3003_v31, %v4016_v30 }
 0x1bb   : > { %v1446_v35 = vpop.permute.xlu1 %1445 }
 0x1bc   : > { %vm1482_vm14 = vcmp.eq.s32.totalorder %v2995_v27, %v1446_v35  ;;  %vm1483_vm15 = vcmp.eq.s32.totalorder %v3003_v31, %v1446_v35  ;;  %v1279_v16 = vpop.permute.xlu0 %1278 }
 0x1bd   : > { %v2354_v42 = vsel %vm1482_vm14, 1.0, %v2784_v34  ;;  %v2355_v0 = vsel %vm1483_vm15, 1.0, %v2784_v34  ;;  %vm1312_vm12 = vcmp.eq.s32.totalorder %v2995_v27, %v1279_v16  ;;  %vm1313_vm13 = vcmp.eq.s32.totalorder %v3003_v31, %v1279_v16 }
 0x1be   : > { %v1578_v53 = vadd.f32 %v2354_v42, %v1402_v26  ;;  %v1579_v38 = vadd.f32 %v2355_v0, %v1403_v28  ;;  %v2328_v35 = vsel %vm1312_vm12, 1.0, %v2784_v34  ;;  %v2329_v26 = vsel %vm1313_vm13, 1.0, %v2784_v34 }
 0x1bf   : > { %v1276_v8 = vpop.permute.xlu2 %1275 }
 0x1c0   : > { %v1600_v48 = vpack.c.bf16 %v1580_v47, %v1578_v53  ;;  %v1601_v17 = vpack.c.bf16 %v1581_v39, %v1579_v38  ;;  %vm1310_vm14 = vcmp.eq.s32.totalorder %v2995_v27, %v1276_v8  ;;  %vm1311_vm15 = vcmp.eq.s32.totalorder %v3003_v31, %v1276_v8 }
 0x1c1   : > { %v2326_v28 = vsel %vm1310_vm14, 1.0, %v2784_v34  ;;  %v2327_v19 = vsel %vm1311_vm15, 1.0, %v2784_v34 }
 0x1c2   : > { %1767 = vmatmul.bf16.gmra.mxu2 %v1600_v48  ;;  %1816 = vmatmul.bf16.gmra.mxu3 %v1601_v17 }
 0x1c4   : > { %v1246_v50 = vpop.permute.xlu1 %1245 }
 0x1c5   : > { %vm1290_vm0 = vcmp.eq.s32.totalorder %v2995_v27, %v1246_v50  ;;  %vm1291_vm1 = vcmp.eq.s32.totalorder %v3003_v31, %v1246_v50 }
 0x1c6   : > { %v2306_v9 = vsel %vm1290_vm0, 1.0, %v2784_v34  ;;  %v2307_v51 = vsel %vm1291_vm1, 1.0, %v2784_v34 }
 0x1c7   : > { %v1386_v4 = vadd.f32 %v2306_v9, %v3762_v3  ;;  %v1387_v60 = vadd.f32 %v2307_v51, %v3765_v52 }
 0x1c8   : > { %v1455_v62 = vpop.permute.xlu2 %1454 }
 0x1c9   : > { %v1562_v3 = vadd.f32 %v2338_v29, %v1386_v4  ;;  %v1563_v52 = vadd.f32 %v2339_v44, %v1387_v60  ;;  %vm1488_vm0 = vcmp.eq.s32.totalorder %v2995_v27, %v1455_v62  ;;  %vm1489_vm1 = vcmp.eq.s32.totalorder %v3003_v31, %v1455_v62 }
 0x1ca   : > { %v2360_v53 = vsel %vm1488_vm0, 1.0, %v2784_v34  ;;  %v2361_v47 = vsel %vm1489_vm1, 1.0, %v2784_v34 }
 0x1cd   : > { %v1425_v61 = vpop.permute.xlu1 %1424 }
 0x1ce   : > { %vm1468_vm6 = vcmp.eq.s32.totalorder %v2995_v27, %v1425_v61  ;;  %vm1469_vm7 = vcmp.eq.s32.totalorder %v3003_v31, %v1425_v61 }
 0x1cf   : > { %v2340_v46 = vsel %vm1468_vm6, 1.0, %v2784_v34  ;;  %v2341_v24 = vsel %vm1469_vm7, 1.0, %v2784_v34 }
 0x1d0   : > { %v1564_v59 = vadd.f32 %v2340_v46, %v1388_v55  ;;  %v1565_v45 = vadd.f32 %v2341_v24, %v1389_v21 }
 0x1d1   : > { %v1255_v9 = vpop.permute.xlu2 %1254 }
 0x1d2   : > { %v1592_v1 = vpack.c.bf16 %v1564_v59, %v1562_v3  ;;  %v1593_v41 = vpack.c.bf16 %v1565_v45, %v1563_v52  ;;  %vm1296_vm6 = vcmp.eq.s32.totalorder %v2995_v27, %v1255_v9  ;;  %vm1297_vm7 = vcmp.eq.s32.totalorder %v3003_v31, %v1255_v9 }
 0x1d3   : > { %v2312_v44 = vsel %vm1296_vm6, 1.0, %v2784_v34  ;;  %v2313_v61 = vsel %vm1297_vm7, 1.0, %v2784_v34  ;;  %v2342_v59 = vsel %vm1470_vm8, 1.0, %v2784_v34  ;;  %v2343_v52 = vsel %vm1471_vm9, 1.0, %v2784_v34 }
 0x1d4   : > { %1747 = vmatmul.bf16.gmra.mxu0 %v1592_v1  ;;  %1796 = vmatmul.bf16.gmra.mxu1 %v1593_v41  ;;  %v1392_v24 = vadd.f32 %v2312_v44, %v3774_v7  ;;  %v1393_v3 = vadd.f32 %v2313_v61, %v3776_v43  ;;  %v1285_v43 = vpop.permute.xlu0 %1284 }
 0x1d5   : > { %vm1316_vm0 = vcmp.eq.s32.totalorder %v2995_v27, %v1285_v43  ;;  %vm1317_vm1 = vcmp.eq.s32.totalorder %v3003_v31, %v1285_v43 }
 0x1d6   : > { %v1103_v10 = vpop.permute.xlu1 %1102 }
 0x1d7   : > { %vm1136_vm10 = vcmp.eq.s32.totalorder %v2995_v27, %v1103_v10  ;;  %vm1137_vm11 = vcmp.eq.s32.totalorder %v3003_v31, %v1103_v10 }
 0x1d8   : > { %v2296_v23 = vsel %vm1136_vm10, 1.0, %v2784_v34  ;;  %v2297_v14 = vsel %vm1137_vm11, 1.0, %v2784_v34 }
 0x1d9   : > { %v1232_v33 = vadd.f32 %v2296_v23, %v3721_v6  ;;  %v1233_v40 = vadd.f32 %v2297_v14, %v3723_v25  ;;  %v1230_v6 = vadd.f32 %v2294_v63, %v3705_v12  ;;  %v1231_v25 = vadd.f32 %v2295_v5, %v3708_v11 }
 0x1da   : > { %v1106_v4 = vpop.permute.xlu2 %1105 }
 0x1db   : > { %v1408_v42 = vadd.f32 %v2328_v35, %v1232_v33  ;;  %v1409_v0 = vadd.f32 %v2329_v26, %v1233_v40  ;;  %v1406_v39 = vadd.f32 %v2326_v28, %v1230_v6  ;;  %v1407_v48 = vadd.f32 %v2327_v19, %v1231_v25 }
 0x1dc   : > { %vm1138_vm12 = vcmp.eq.s32.totalorder %v2995_v27, %v1106_v4  ;;  %vm1139_vm13 = vcmp.eq.s32.totalorder %v3003_v31, %v1106_v4  ;;  %v2332_v35 = vsel %vm1316_vm0, 1.0, %v2784_v34  ;;  %v2333_v26 = vsel %vm1317_vm1, 1.0, %v2784_v34  ;;  %v1434_v9 = vpop.permute.xlu0 %1433 }
 0x1dd   : > { %v1584_v50 = vadd.f32 %v2360_v53, %v1408_v42  ;;  %v1585_v20 = vadd.f32 %v2361_v47, %v1409_v0  ;;  %v2298_v40 = vsel %vm1138_vm12, 1.0, %v2784_v34  ;;  %v2299_v63 = vsel %vm1139_vm13, 1.0, %v2784_v34 }
 0x1de   : > { %vm1474_vm12 = vcmp.eq.s32.totalorder %v2995_v27, %v1434_v9  ;;  %vm1475_vm13 = vcmp.eq.s32.totalorder %v3003_v31, %v1434_v9 }
 0x1df   : > { %v1452_v38 = vpop.permute.xlu1 %1451  ;;  %v2346_v44 = vsel %vm1474_vm12, 1.0, %v2784_v34  ;;  %v2347_v61 = vsel %vm1475_vm13, 1.0, %v2784_v34 }
 0x1e0   : > { %vm1486_vm2 = vcmp.eq.s32.totalorder %v2995_v27, %v1452_v38  ;;  %vm1487_vm3 = vcmp.eq.s32.totalorder %v3003_v31, %v1452_v38 }
 0x1e1   : > { %v2358_v17 = vsel %vm1486_vm2, 1.0, %v2784_v34  ;;  %v2359_v36 = vsel %vm1487_vm3, 1.0, %v2784_v34 }
 0x1e2   : > { %v1582_v12 = vadd.f32 %v2358_v17, %v1406_v39  ;;  %v1583_v11 = vadd.f32 %v2359_v36, %v1407_v48 }
 0x1e3   : > { %v1282_v16 = vpop.permute.xlu2 %1281 }
 0x1e4   : > { %v1602_v51 = vpack.c.bf16 %v1584_v50, %v1582_v12  ;;  %v1603_v37 = vpack.c.bf16 %v1585_v20, %v1583_v11  ;;  %vm1314_vm2 = vcmp.eq.s32.totalorder %v2995_v27, %v1282_v16  ;;  %vm1315_vm3 = vcmp.eq.s32.totalorder %v3003_v31, %v1282_v16 }
 0x1e5   : > { %v2330_v28 = vsel %vm1314_vm2, 1.0, %v2784_v34  ;;  %v2331_v19 = vsel %vm1315_vm3, 1.0, %v2784_v34 }
 0x1e6   : > { %1772 = vmatmul.bf16.gmra.mxu2 %v1602_v51  ;;  %1821 = vmatmul.bf16.gmra.mxu3 %v1603_v37 }
 0x1e8   : > { %v1252_v18 = vpop.permute.xlu1 %1251 }
 0x1e9   : > { %vm1294_vm4 = vcmp.eq.s32.totalorder %v2995_v27, %v1252_v18  ;;  %vm1295_vm5 = vcmp.eq.s32.totalorder %v3003_v31, %v1252_v18 }
 0x1ea   : > { %v2310_v60 = vsel %vm1294_vm4, 1.0, %v2784_v34  ;;  %v2311_v29 = vsel %vm1295_vm5, 1.0, %v2784_v34 }
 0x1eb   : > { %v1390_v55 = vadd.f32 %v2310_v60, %v3805_v13  ;;  %v1391_v21 = vadd.f32 %v2311_v29, %v3808_v32 }
 0x1ec   : > { %v1461_v5 = vpop.permute.xlu2 %1460 }
 0x1ed   : > { %v1566_v13 = vadd.f32 %v2342_v59, %v1390_v55  ;;  %v1567_v32 = vadd.f32 %v2343_v52, %v1391_v21  ;;  %vm1492_vm4 = vcmp.eq.s32.totalorder %v2995_v27, %v1461_v5  ;;  %vm1493_vm5 = vcmp.eq.s32.totalorder %v3003_v31, %v1461_v5 }
 0x1ee   : > { %v2364_v42 = vsel %vm1492_vm4, 1.0, %v2784_v34  ;;  %v2365_v0 = vsel %vm1493_vm5, 1.0, %v2784_v34 }
 0x1f1   : > { %v1431_v46 = vpop.permute.xlu1 %1430 }
 0x1f2   : > { %vm1472_vm10 = vcmp.eq.s32.totalorder %v2995_v27, %v1431_v46  ;;  %vm1473_vm11 = vcmp.eq.s32.totalorder %v3003_v31, %v1431_v46 }
 0x1f3   : > { %v2344_v45 = vsel %vm1472_vm10, 1.0, %v2784_v34  ;;  %v2345_v30 = vsel %vm1473_vm11, 1.0, %v2784_v34 }
 0x1f4   : > { %v1568_v8 = vadd.f32 %v2344_v45, %v1392_v24  ;;  %v1569_v1 = vadd.f32 %v2345_v30, %v1393_v3 }
 0x1f5   : > { %v1261_v20 = vpop.permute.xlu2 %1260 }
 0x1f6   : > { %v1594_v41 = vpack.c.bf16 %v1568_v8, %v1566_v13  ;;  %v1595_v7 = vpack.c.bf16 %v1569_v1, %v1567_v32  ;;  %vm1300_vm10 = vcmp.eq.s32.totalorder %v2995_v27, %v1261_v20  ;;  %vm1301_vm11 = vcmp.eq.s32.totalorder %v3003_v31, %v1261_v20 }
 0x1f7   : > { %v2316_v18 = vsel %vm1300_vm10, 1.0, %v2784_v34  ;;  %v2317_v4 = vsel %vm1301_vm11, 1.0, %v2784_v34 }
 0x1f8   : > { %1752 = vmatmul.bf16.gmra.mxu0 %v1594_v41  ;;  %1801 = vmatmul.bf16.gmra.mxu1 %v1595_v7  ;;  %v1396_v21 = vadd.f32 %v2316_v18, %v3839_v2  ;;  %v1397_v46 = vadd.f32 %v2317_v4, %v3842_v22 }
 0x1fa   : > { %v1109_v10 = vpop.permute.xlu1 %1108 }
 0x1fb   : > { %vm1140_vm14 = vcmp.eq.s32.totalorder %v2995_v27, %v1109_v10  ;;  %vm1141_vm15 = vcmp.eq.s32.totalorder %v3003_v31, %v1109_v10 }
 0x1fc   : > { %v2300_v23 = vsel %vm1140_vm14, 1.0, %v2784_v34  ;;  %v2301_v14 = vsel %vm1141_vm15, 1.0, %v2784_v34 }
 0x1fd   : > { %v1236_v62 = vadd.f32 %v2300_v23, %v3739_v56  ;;  %v1237_v33 = vadd.f32 %v2301_v14, %v3742_v54  ;;  %v1234_v56 = vadd.f32 %v2298_v40, %v3825_v49  ;;  %v1235_v54 = vadd.f32 %v2299_v63, %v3828_v15 }
 0x1ff   : > { %v1412_v6 = vadd.f32 %v2332_v35, %v1236_v62  ;;  %v1413_v25 = vadd.f32 %v2333_v26, %v1237_v33  ;;  %v1410_v47 = vadd.f32 %v2330_v28, %v1234_v56  ;;  %v1411_v38 = vadd.f32 %v2331_v19, %v1235_v54 }
 0x201   : > { %v1588_v17 = vadd.f32 %v2364_v42, %v1412_v6  ;;  %v1589_v36 = vadd.f32 %v2365_v0, %v1413_v25 }
 0x203   : > { %v1458_v53 = vpop.permute.xlu1 %1457 }
 0x204   : > { %vm1490_vm6 = vcmp.eq.s32.totalorder %v2995_v27, %v1458_v53  ;;  %vm1491_vm7 = vcmp.eq.s32.totalorder %v3003_v31, %v1458_v53 }
 0x205   : > { %v2362_v39 = vsel %vm1490_vm6, 1.0, %v2784_v34  ;;  %v2363_v48 = vsel %vm1491_vm7, 1.0, %v2784_v34 }
 0x206   : > { %v1586_v49 = vadd.f32 %v2362_v39, %v1410_v47  ;;  %v1587_v15 = vadd.f32 %v2363_v48, %v1411_v38 }
 0x208   : > { %v1604_v12 = vpack.c.bf16 %v1588_v17, %v1586_v49  ;;  %v1605_v50 = vpack.c.bf16 %v1589_v36, %v1587_v15 }
 0x20a   : > { %1777 = vmatmul.bf16.gmra.mxu2 %v1604_v12  ;;  %1826 = vmatmul.bf16.gmra.mxu3 %v1605_v50 }
 0x20c   : > { %v1258_v11 = vpop.permute.xlu1 %1257 }
 0x20d   : > { %vm1298_vm8 = vcmp.eq.s32.totalorder %v2995_v27, %v1258_v11  ;;  %vm1299_vm9 = vcmp.eq.s32.totalorder %v3003_v31, %v1258_v11 }
 0x20e   : > { %v2314_v51 = vsel %vm1298_vm8, 1.0, %v2784_v34  ;;  %v2315_v37 = vsel %vm1299_vm9, 1.0, %v2784_v34 }
 0x20f   : > { %v1394_v60 = vadd.f32 %v2314_v51, %v3887_v57  ;;  %v1395_v29 = vadd.f32 %v2315_v37, %v3890_v58 }
 0x211   : > { %v1570_v57 = vadd.f32 %v2346_v44, %v1394_v60  ;;  %v1571_v59 = vadd.f32 %v2347_v61, %v1395_v29 }
 0x215   : > { %v1437_v55 = vpop.permute.xlu1 %1436 }
 0x216   : > { %vm1476_vm14 = vcmp.eq.s32.totalorder %v2995_v27, %v1437_v55  ;;  %vm1477_vm15 = vcmp.eq.s32.totalorder %v3003_v31, %v1437_v55 }
 0x217   : > { %v2348_v24 = vsel %vm1476_vm14, 1.0, %v2784_v34  ;;  %v2349_v3 = vsel %vm1477_vm15, 1.0, %v2784_v34 }
 0x218   : > { %v1572_v58 = vadd.f32 %v2348_v24, %v1396_v21  ;;  %v1573_v52 = vadd.f32 %v2349_v3, %v1397_v46 }
 0x21a   : > { %v1596_v45 = vpack.c.bf16 %v1572_v58, %v1570_v57  ;;  %v1597_v30 = vpack.c.bf16 %v1573_v52, %v1571_v59 }
 0x21c   : > { %1757 = vmatmul.bf16.gmra.mxu0 %v1596_v45  ;;  %1806 = vmatmul.bf16.gmra.mxu1 %v1597_v30 }
 0x221   : > { %v1763_v13 = vpop.f32.mrf.mxu2  ;;  %v1812_v2 = vpop.f32.mrf.mxu3 }
 0x222   : > { %v1813_v8 = vadd.f32 %v1812_v2, %v1763_v13 }
 0x224   : > { %1840 = vst [vmem:[#allocation2 + $0x40] sm:$0xff] %v1813_v8 }
 0x229   : > { %v1765_v22 = vpop.f32.mrf.mxu2  ;;  %v1814_v27 = vpop.f32.mrf.mxu3 }
 0x22a   : > { %v1815_v32 = vadd.f32 %v1814_v27, %v1765_v22 }
 0x22c   : > { %1841 = vst [vmem:[#allocation2 + $0x20] sm:$0xff] %v1815_v32 }
 0x22d   : > { %v1743_v31 = vpop.f32.mrf.mxu0  ;;  %v1792_v1 = vpop.f32.mrf.mxu1 }
 0x22e   : > { %v1793_v41 = vadd.f32 %v1792_v1, %v1743_v31 }
 0x230   : > { %1832 = vst [vmem:[#allocation2 + $0x30] sm:$0xff] %v1793_v41 }
 0x235   : > { %v1745_v34 = vpop.f32.mrf.mxu0  ;;  %v1794_v7 = vpop.f32.mrf.mxu1 }
 0x236   : > { %v1795_v16 = vadd.f32 %v1794_v7, %v1745_v34 }
 0x238   : > { %1833 = vst [vmem:[#allocation2] sm:$0xff] %v1795_v16 }
 0x245   : > { %v1768_v43 = vpop.f32.mrf.mxu2  ;;  %v1817_v10 = vpop.f32.mrf.mxu3 }
 0x246   : > { %v1818_v23 = vadd.f32 %v1817_v10, %v1768_v43 }
 0x248   : > { %1842 = vst [vmem:[#allocation2 + $0x10] sm:$0xff] %v1818_v23 }
 0x24d   : > { %v1770_v14 = vpop.f32.mrf.mxu2  ;;  %v1819_v62 = vpop.f32.mrf.mxu3 }
 0x24e   : > { %v1820_v33 = vadd.f32 %v1819_v62, %v1770_v14 }
 0x250   : > { %1843 = vst [vmem:[#allocation2 + $0x38] sm:$0xff] %v1820_v33 }
 0x251   : > { %v1748_v40 = vpop.f32.mrf.mxu0  ;;  %v1797_v63 = vpop.f32.mrf.mxu1 }
 0x252   : > { %v1798_v5 = vadd.f32 %v1797_v63, %v1748_v40 }
 0x254   : > { %1834 = vst [vmem:[#allocation2 + $0x58] sm:$0xff] %v1798_v5 }
 0x259   : > { %v1750_v35 = vpop.f32.mrf.mxu0  ;;  %v1799_v26 = vpop.f32.mrf.mxu1 }
 0x25a   : > { %v1800_v28 = vadd.f32 %v1799_v26, %v1750_v35 }
 0x25c   : > { %1835 = vst [vmem:[#allocation2 + $0x18] sm:$0xff] %v1800_v28 }
 0x269   : > { %v1773_v19 = vpop.f32.mrf.mxu2  ;;  %v1822_v56 = vpop.f32.mrf.mxu3 }
 0x26a   : > { %v1823_v54 = vadd.f32 %v1822_v56, %v1773_v19 }
 0x26c   : > { %1844 = vst [vmem:[#allocation2 + $0x60] sm:$0xff] %v1823_v54 }
 0x271   : > { %v1775_v6 = vpop.f32.mrf.mxu2  ;;  %v1824_v25 = vpop.f32.mrf.mxu3 }
 0x272   : > { %v1825_v42 = vadd.f32 %v1824_v25, %v1775_v6 }
 0x274   : > { %1845 = vst [vmem:[#allocation2 + $0x70] sm:$0xff] %v1825_v42 }
 0x275   : > { %v1753_v0 = vpop.f32.mrf.mxu0  ;;  %v1802_v53 = vpop.f32.mrf.mxu1 }
 0x276   : > { %v1803_v47 = vadd.f32 %v1802_v53, %v1753_v0 }
 0x278   : > { %1836 = vst [vmem:[#allocation2 + $0x50] sm:$0xff] %v1803_v47 }
 0x27d   : > { %v1755_v38 = vpop.f32.mrf.mxu0  ;;  %v1804_v39 = vpop.f32.mrf.mxu1 }
 0x27e   : > { %v1805_v48 = vadd.f32 %v1804_v39, %v1755_v38 }
 0x280   : > { %1837 = vst [vmem:[#allocation2 + $0x68] sm:$0xff] %v1805_v48 }
 0x28d   : > { %v1778_v49 = vpop.f32.mrf.mxu2  ;;  %v1827_v17 = vpop.f32.mrf.mxu3 }
 0x28e   : > { %v1828_v15 = vadd.f32 %v1827_v17, %v1778_v49 }
 0x290   : > { %1846 = vst [vmem:[#allocation2 + $0x78] sm:$0xff] %v1828_v15 }
 0x295   : > { %v1780_v36 = vpop.f32.mrf.mxu2  ;;  %v1829_v12 = vpop.f32.mrf.mxu3 }
 0x296   : > { %v1830_v50 = vadd.f32 %v1829_v12, %v1780_v36 }
 0x298   : > { %1847 = vst [vmem:[#allocation2 + $0x28] sm:$0xff] %v1830_v50 }
 0x299   : > { %v1758_v11 = vpop.f32.mrf.mxu0  ;;  %v1807_v20 = vpop.f32.mrf.mxu1 }
 0x29a   : > { %v1808_v9 = vadd.f32 %v1807_v20, %v1758_v11 }
 0x29c   : > { %1838 = vst [vmem:[#allocation2 + $0x8] sm:$0xff] %v1808_v9 }
 0x2a1   : > { %v1760_v51 = vpop.f32.mrf.mxu0  ;;  %v1809_v37 = vpop.f32.mrf.mxu1 }
 0x2a2   : > { %v1810_v18 = vadd.f32 %v1809_v37, %v1760_v51 }
 0x2a4   : > { %1839 = vst [vmem:[#allocation2 + $0x48] sm:$0xff] %v1810_v18 }
 0x2a5 PF: > { %s2430_s6 = sshll.u32 %s2762_s12, 7  ;;  %v1869_v24 = vld [vmem:[#allocation2 + $0x30] sm:$0xff]  ;;  %v1870_v3 = vld [vmem:[#allocation2] sm:$0xff]  ;;  %v1874_v59 = vld [vmem:[#allocation2 + $0x68] sm:$0xff]  ;;  %s2494_s17 = sshll.u32 %s2766_s13, 5 }
 0x2a6   : > { %s1849_s30 = sshra.s32 %s2430_s6, 3  ;;  %v1873_v57 = vld [vmem:[#allocation2 + $0x50] sm:$0xff]  ;;  %v1877_v58 = vld [vmem:[#allocation2 + $0x40] sm:$0xff]  ;;  %v1885_v13 = vpack.c.bf16 %v1870_v3, %v1869_v24  ;;  %v1871_v27 = vld [vmem:[#allocation2 + $0x58] sm:$0xff]  ;;  %s2018_s18 = sadd.s32 %s2762_s12, %s2494_s17 }
 0x2a7   : > { %s2431_s3 = sshll.u32 %s1849_s30, 2  ;;  %v1878_v52 = vld [vmem:[#allocation2 + $0x20] sm:$0xff]  ;;  %v1882_v30 = vld [vmem:[#allocation2 + $0x70] sm:$0xff]  ;;  %v1887_v2 = vpack.c.bf16 %v1874_v59, %v1873_v57  ;;  %v1872_v32 = vld [vmem:[#allocation2 + $0x18] sm:$0xff]  ;;  %s2467_s21 = sshll.u32 %s2018_s18, 3 }
 0x2a8   : > { %s4130_s8 = scalar_lea.vmem %s4203_s1, %s2431_s3  ;;  %v1881_v45 = vld [vmem:[#allocation2 + $0x60] sm:$0xff]  ;;  %v1889_v8 = vpack.c.bf16 %v1878_v52, %v1877_v58  ;;  %v1875_v31 = vld [vmem:[#allocation2 + $0x8] sm:$0xff]  ;;  %v1879_v41 = vld [vmem:[#allocation2 + $0x10] sm:$0xff]  ;;  %v1886_v43 = vpack.c.bf16 %v1872_v32, %v1871_v27  ;;  %s2020_s25 = scalar_lea.hbm %s4204_s2, %s2467_s21 }
 0x2a9   : > { %v2493_v4 = vld [vmem:[%s4130_s8 + $0x38] sm:$0xff]  ;;  %v2492_v60 = vld [vmem:[%s4130_s8 + $0x30] sm:$0xff]  ;;  %v2491_v29 = vld [vmem:[%s4130_s8 + $0x28] sm:$0xff]  ;;  %v1891_v22 = vpack.c.bf16 %v1882_v30, %v1881_v45  ;;  %s2021_s26 = sshll.u32 %s2887_s7, 4  ;;  %s2023_s12 = sshll.u32 %s2020_s25, 4  ;;  %s2022_s26 = int_to_ptr.vmem [resolvable:$true] %s2021_s26  ;;  %s2024_s12 = int_to_ptr.hbm [resolvable:$true] %s2023_s12 }
 0x2aa   : > { %1941 = vmatpush.bf16.xpose.msra.mxu0 %v2493_v4  ;;  %2511 = vmatpush.bf16.xpose.msra.mxu1 %v2493_v4  ;;  %v2490_v44 = vld [vmem:[%s4130_s8 + $0x20] sm:$0xff]  ;;  %v2489_v61 = vld [vmem:[%s4130_s8 + $0x18] sm:$0xff]  ;;  %v2488_v55 = vld [vmem:[%s4130_s8 + $0x10] sm:$0xff]  ;;  %s2007_s29 = scalar_lea.sflag [#allocation4], %s149_s28  ;;  %s2698_s6 = sshra.s32 %s2024_s12, 4  ;;  %s2699_s6 = int_to_ptr.hbm [resolvable:$true] %s2698_s6 }
 0x2ab   : > { %2512 = vmatpush.bf16.xpose.msra.mxu2 %v2493_v4  ;;  %2513 = vmatpush.bf16.xpose.msra.mxu3 %v2493_v4  ;;  %v2487_v21 = vld [vmem:[%s4130_s8 + $0x8] sm:$0xff]  ;;  %v2486_v46 = vld [vmem:[%s4130_s8] sm:$0xff]  ;;  %v1880_v34 = vld [vmem:[#allocation2 + $0x38] sm:$0xff]  ;;  %s2700_s30 = scalar_lea.hbm %s2699_s6, 128  ;;  %s2704_s5 = scalar_lea.hbm %s4204_s2, 512 }
 0x2ac   : > { %v1876_v1 = vld [vmem:[#allocation2 + $0x48] sm:$0xff]  ;;  %v1883_v7 = vld [vmem:[#allocation2 + $0x78] sm:$0xff]  ;;  %v1890_v23 = vpack.c.bf16 %v1880_v34, %v1879_v41  ;;  %p2701_p0 = scmp.ne.s32.totalorder %s2699_s6, %s2700_s30  ;;  %p2705_p4 = scmp.lt.s32.totalorder %s2699_s6, %s4204_s2 }
 0x2ad   : > { %v1884_v16 = vld [vmem:[#allocation2 + $0x28] sm:$0xff]  ;;  %v1888_v10 = vpack.c.bf16 %v1876_v1, %v1875_v31  ;;  %p2706_p5 = scmp.lt.s32.totalorder %s2704_s5, %s2700_s30 }
 0x2ae   : > { %v1892_v14 = vpack.c.bf16 %v1884_v16, %v1883_v7  ;;  %p2702_p1 = pnand %p2701_p0, %p2858_p3 }
 0x2af   : > { %p2707_p6 = por %p2706_p5, %p2705_p4 }
 0x2b0   : > { %p2703_p2 = pneg %p2702_p1 }
 0x2b2   : > { %1942 = vmatpush.bf16.xpose.msra.mxu0 %v2492_v60  ;;  %2514 = vmatpush.bf16.xpose.msra.mxu1 %v2492_v60  ;;  %p2708_p7 = pnand %p2707_p6, %p2703_p2 }
 0x2b3   : > { %2515 = vmatpush.bf16.xpose.msra.mxu2 %v2492_v60  ;;  %2516 = vmatpush.bf16.xpose.msra.mxu3 %v2492_v60 }
 0x2ba   : > { %1943 = vmatpush.bf16.xpose.msra.mxu0 %v2491_v29  ;;  %2517 = vmatpush.bf16.xpose.msra.mxu1 %v2491_v29 }
 0x2bb   : > { %2518 = vmatpush.bf16.xpose.msra.mxu2 %v2491_v29  ;;  %2519 = vmatpush.bf16.xpose.msra.mxu3 %v2491_v29 }
 0x2c2   : > { %1944 = vmatpush.bf16.xpose.msra.mxu0 %v2490_v44  ;;  %2520 = vmatpush.bf16.xpose.msra.mxu1 %v2490_v44 }
 0x2c3   : > { %2521 = vmatpush.bf16.xpose.msra.mxu2 %v2490_v44  ;;  %2522 = vmatpush.bf16.xpose.msra.mxu3 %v2490_v44 }
 0x2ca   : > { %1945 = vmatpush.bf16.xpose.msra.mxu0 %v2489_v61  ;;  %2523 = vmatpush.bf16.xpose.msra.mxu1 %v2489_v61 }
 0x2cb   : > { %2524 = vmatpush.bf16.xpose.msra.mxu2 %v2489_v61  ;;  %2525 = vmatpush.bf16.xpose.msra.mxu3 %v2489_v61 }
 0x2d2   : > { %1946 = vmatpush.bf16.xpose.msra.mxu0 %v2488_v55  ;;  %2526 = vmatpush.bf16.xpose.msra.mxu1 %v2488_v55 }
 0x2d3   : > { %2527 = vmatpush.bf16.xpose.msra.mxu2 %v2488_v55  ;;  %2528 = vmatpush.bf16.xpose.msra.mxu3 %v2488_v55 }
 0x2da   : > { %1947 = vmatpush.bf16.xpose.msra.mxu0 %v2487_v21  ;;  %2529 = vmatpush.bf16.xpose.msra.mxu1 %v2487_v21 }
 0x2db   : > { %2530 = vmatpush.bf16.xpose.msra.mxu2 %v2487_v21  ;;  %2531 = vmatpush.bf16.xpose.msra.mxu3 %v2487_v21 }
 0x2e2   : > { %1948 = vmatpush.bf16.xpose.msra.mxu0 %v2486_v46  ;;  %2532 = vmatpush.bf16.xpose.msra.mxu1 %v2486_v46 }
 0x2e3   : > { %2533 = vmatpush.bf16.xpose.msra.mxu2 %v2486_v46  ;;  %2534 = vmatpush.bf16.xpose.msra.mxu3 %v2486_v46 }
 0x2e9   : > { %1949 = vmatmul.bf16.vlgmr.msra.gmra.mxu0 %v1885_v13  ;;  %1959 = vmatmul.bf16.vlgmr.msra.gmra.mxu1 %v1887_v2 }
 0x2ea   : > { %1969 = vmatmul.bf16.vlgmr.msra.gmra.mxu2 %v1889_v8  ;;  %1979 = vmatmul.bf16.vlgmr.msra.gmra.mxu3 %v1891_v22 }
 0x2f9   : > { %1954 = vmatmul.bf16.gmra.mxu0 %v1886_v43  ;;  %1964 = vmatmul.bf16.gmra.mxu1 %v1888_v10 }
 0x2fa   : > { %1974 = vmatmul.bf16.gmra.mxu2 %v1890_v23  ;;  %1984 = vmatmul.bf16.gmra.mxu3 %v1892_v14 }
 0x366   : > { %v1950_v62 = vpop.f32.mrf.mxu0  ;;  %v1960_v33 = vpop.f32.mrf.mxu1 }
 0x367   : > { %1990 = vst [vmem:[%s2887_s7] sm:$0xff] %v1950_v62 }
 0x368   : > { %1994 = vst [vmem:[%s2887_s7 + $0x20] sm:$0xff] %v1960_v33 }
 0x36d   : > { %v1970_v40 = vpop.f32.mrf.mxu2  ;;  %v1980_v63 = vpop.f32.mrf.mxu3 }
 0x36e   : > { %1998 = vst [vmem:[%s2887_s7 + $0x40] sm:$0xff] %v1970_v40  ;;  %v1952_v5 = vpop.f32.mrf.mxu0  ;;  %v1962_v35 = vpop.f32.mrf.mxu1 }
 0x36f   : > { %2002 = vst [vmem:[%s2887_s7 + $0x60] sm:$0xff] %v1980_v63 }
 0x370   : > { %1991 = vst [vmem:[%s2887_s7 + $0x8] sm:$0xff] %v1952_v5 }
 0x371   : > { %1995 = vst [vmem:[%s2887_s7 + $0x28] sm:$0xff] %v1962_v35 }
 0x375   : > { %v1972_v26 = vpop.f32.mrf.mxu2  ;;  %v1982_v28 = vpop.f32.mrf.mxu3 }
 0x376   : > { %1999 = vst [vmem:[%s2887_s7 + $0x48] sm:$0xff] %v1972_v26  ;;  %v1955_v19 = vpop.f32.mrf.mxu0  ;;  %v1965_v56 = vpop.f32.mrf.mxu1 }
 0x377   : > { %2003 = vst [vmem:[%s2887_s7 + $0x68] sm:$0xff] %v1982_v28 }
 0x378   : > { %1992 = vst [vmem:[%s2887_s7 + $0x10] sm:$0xff] %v1955_v19 }
 0x379   : > { %1996 = vst [vmem:[%s2887_s7 + $0x30] sm:$0xff] %v1965_v56 }
 0x37d   : > { %v1975_v54 = vpop.f32.mrf.mxu2  ;;  %v1985_v6 = vpop.f32.mrf.mxu3 }
 0x37e   : > { %2000 = vst [vmem:[%s2887_s7 + $0x50] sm:$0xff] %v1975_v54  ;;  %v1957_v25 = vpop.f32.mrf.mxu0  ;;  %v1967_v42 = vpop.f32.mrf.mxu1 }
 0x37f   : > { %2004 = vst [vmem:[%s2887_s7 + $0x70] sm:$0xff] %v1985_v6 }
 0x380   : > { %1993 = vst [vmem:[%s2887_s7 + $0x18] sm:$0xff] %v1957_v25 }
 0x381   : > { %1997 = vst [vmem:[%s2887_s7 + $0x38] sm:$0xff] %v1967_v42 }
 0x385   : > { %v1977_v0 = vpop.f32.mrf.mxu2  ;;  %v1987_v53 = vpop.f32.mrf.mxu3 }
 0x386   : > { %2001 = vst [vmem:[%s2887_s7 + $0x58] sm:$0xff] %v1977_v0 }
 0x387   : > { %2005 = vst [vmem:[%s2887_s7 + $0x78] sm:$0xff] %v1987_v53 }
 0x388   : > { %2711 = shalt.err (!%p2708_p7)
}
 0x389   : > { %s2789_s28 = smov 128   ;;  %s2790_s7 = smov 256  }
 0x38a   : > { %s2791_s18 = smov 8  }
 0x38b   : > { %2535 = dma.vmem_to_hbm [thread:$0]  (%p2858_p3), %s2022_s26, 2048, %s2024_s12, %s2007_s29, %s2789_s28, %s2790_s7, %s2791_s18  }
 0x38c PF: > { %p2541_p9 = scmp.ge.s32.totalorder %s2778_s16, 2  ;;  %s2038_s21 = sand.u32 1, %s2750_s9  }
 0x38d   : > { %s2039_s13 = scalar_lea.sflag [#allocation4], %s2038_s21 }
 0x38e   : > { %p2538_p10 = pnand %p2541_p9, %p2867_p8 }
 0x390   : > { %p2539_p11 = pneg %p2538_p10 }
 0x392   : > { %2745 = dma.done.wait (%p2539_p11), %s2039_s13, 2048  }
 0x393   : > { %2747 = vsyncadd (%p2539_p11), %s2039_s13, 4294965248  ;;  %s15_s16 = sadd.s32 1, %s2778_s16   ;;  %s4207_s9 = smov %s2754_s10 }
 0x394   : > { %p12_p12 = scmp.ge.s32.totalorder %s15_s16, 6   ;;  %s4208_s10 = smov %s2758_s11 }
 0x395   : > { %s4209_s11 = smov %s2876_s27  ;;  %s4210_s12 = smov %s2770_s14 }
 0x396   : > { %s4211_s13 = smov %s2774_s15  ;;  %s4212_s14 = smov %s4215_s19 }
 0x397   : > { %s4213_s15 = smov %s4219_s20  ;;  %14 = sbr.rel (!%p12_p12) target bundleno = 5 (0x5), region = 68 }
 0x39c   :  { %2045 = vsyncpa [#allocation4], 1 }
 0x39d   :  { %2047 = vsyncpa [#allocation4 + $0x1], 1 }

</bundles_post_ra>
